<compile_context>
chip_gen: v7x
topology: tpu7x:2x2x1
jax: 0.10.0
libtpu: 0.0.40
codegen_flags: <defaults>
</compile_context>

<pallas_src>
import functools

import jax
import jax.numpy as jnp
from jax import lax
from jax.experimental import pallas as pl
from jax.experimental.pallas import tpu as pltpu

INITRANGE = 0.04
STEPS = 8

# DARTS-style architecture: (predecessor, activation) per step.
# activation ids: 0=tanh, 1=relu, 2=sigmoid, 3=identity
ARCH = (0, 0, 0, 1, 1, 2, 1, 0, 2, 3, 3, 1, 4, 2, 5, 0)

_ACT_FNS = {
    0: jnp.tanh,
    1: lambda x: jnp.maximum(x, 0.0),
    2: jax.nn.sigmoid,
    3: lambda x: x,
}


# --------------------------------------------------------------------------------------
# Small generation-aware heuristics (all best-effort; safe fallbacks everywhere).
# --------------------------------------------------------------------------------------
def _device_kind():
    try:
        return jax.devices()[0].device_kind.lower()
    except Exception:
        return ""


def _pick_vmem_limit():
    """~8 MiB headroom below physical VMEM (≈56 MiB on v7x), ≤ ~110 MiB on v5e/v6e."""
    try:
        cap = int(pltpu.get_tpu_info().vmem_capacity_bytes)
        return int(max(min(cap - (8 << 20), 110 << 20), 32 << 20))
    except Exception:
        return 64 << 20


def _default_b_tile(B):
    """MXU M-fill: one full-batch block up to 256 rows (128 on v5e); split only large
    batches.  On v7x prefer exactly 2 batch blocks (one per TensorCore)."""
    if B <= 256:
        return B
    kind = _device_kind()
    if ("v7" in kind or "7x" in kind) and B % 2 == 0 and (B // 2) % 8 == 0 and B // 2 <= 1024:
        return B // 2
    cap = 128 if ("v5 lite" in kind or "v5e" in kind) else 256
    for cand in range(cap, 7, -8):
        if B % cand == 0:
            return cand
    return B


def _same_pred_groups(arch, steps):
    """Group consecutive DAG steps that read the same predecessor state."""
    preds = [arch[2 * i] for i in range(steps)]
    groups = []
    i = 0
    while i < steps:
        j = i + 1
        while j < steps and preds[j] == preds[i]:
            j += 1
        groups.append((i, j - i))
        i = j
    return tuple(groups)


# --------------------------------------------------------------------------------------
# Kernel
# --------------------------------------------------------------------------------------
def _nao_cell_kernel(x_ref, hinit_ref, w0x_hbm, w0h_hbm, ws_hbm, out_ref,
                     h_scratch, w0x_v, w0h_v, ws_v, dma_sems,
                     *, npad, steps, arch, groups, t_tile, compute_dtype):
    """One grid step == one (batch block, time block).  The recurrent carry lives in
    f32 VMEM scratch across time blocks; weights live in single-buffered VMEM scratch
    loaded once per batch block."""
    tt = pl.program_id(1)

    @pl.when(tt == 0)
    def _init():
        # Single-buffered weight residency: weights arrive as raw HBM refs and are
        # DMA'd once per batch block (i.e. once per core's first time block).
        c0 = pltpu.make_async_copy(w0x_hbm, w0x_v, dma_sems.at[0])
        c1 = pltpu.make_async_copy(w0h_hbm, w0h_v, dma_sems.at[1])
        c2 = pltpu.make_async_copy(ws_hbm, ws_v, dma_sems.at[2])
        c0.start(); c1.start(); c2.start()
        c0.wait(); c1.wait(); c2.wait()
        h_scratch[...] = hinit_ref[...].astype(jnp.float32)

    # Loop-invariant weight loads (hoisted out of the time loop).
    w0x = w0x_v[...]                     # (ninp_pad, 2*npad)
    w0h = w0h_v[...]                     # (npad, 2*npad)
    inv_steps = 1.0 / steps

    def step(tau, h):
        # Input + recurrent projections, fused c/h gates (2*npad wide).  The x-dot is
        # independent of the recurrent chain so the scheduler overlaps it with the
        # serial DAG matmuls.
        x = x_ref[tau].astype(compute_dtype)                       # (tb, ninp_pad)
        ch0 = (jnp.dot(x, w0x, preferred_element_type=jnp.float32)
               + jnp.dot(h.astype(compute_dtype), w0h,
                         preferred_element_type=jnp.float32))
        c0g = jax.nn.sigmoid(ch0[:, :npad])
        h0g = jnp.tanh(ch0[:, npad:])
        s0 = h + c0g * (h0g - h)

        states = [s0]
        acc = jnp.zeros_like(s0)
        for (first, glen) in groups:
            pred = arch[2 * first]
            s_prev = states[pred]
            # One fused (npad, glen*2*npad) matmul for all DAG steps sharing s_prev;
            # all slices are lane-aligned multiples of npad (itself a multiple of 128).
            cols = ws_v[:, first * 2 * npad:(first + glen) * 2 * npad]
            ch = jnp.dot(s_prev.astype(compute_dtype), cols,
                         preferred_element_type=jnp.float32)
            for k in range(glen):
                act = arch[2 * (first + k) + 1]
                c = jax.nn.sigmoid(ch[:, (2 * k) * npad:(2 * k + 1) * npad])
                hh = _ACT_FNS[act](ch[:, (2 * k + 1) * npad:(2 * k + 2) * npad])
                s = s_prev + c * (hh - s_prev)
                states.append(s)
                acc = acc + s

        h_new = acc * inv_steps                     # mean over states[1..STEPS]
        out_ref[tau] = h_new.astype(out_ref.dtype)  # lane-dense store (npad % 128 == 0)
        return h_new

    # fori_loop (not a static Python unroll) bounds live ranges per timestep.
    h_last = lax.fori_loop(0, t_tile, step, h_scratch[...])
    h_scratch[...] = h_last


# --------------------------------------------------------------------------------------
# Wrapper
# --------------------------------------------------------------------------------------
def nao_cell_forward(inputs, hidden, w0, ws, *, nhid, steps=STEPS, arch=ARCH,
                     b_tile=None, t_tile=None, param_dtype=jnp.float32,
                     out_dtype=None):
    """inputs: (T, B, ninp), hidden: (1, B, nhid), w0: (ninp+nhid, 2*nhid),
    ws: (STEPS, nhid, 2*nhid).  Returns (hiddens (T,B,nhid), last (1,B,nhid))."""
    T, B, ninp = inputs.shape
    n = nhid
    npad = ((n + 127) // 128) * 128          # lane-dense hidden width
    pad_n = npad - n
    out_dtype = inputs.dtype if out_dtype is None else out_dtype

    # Pad the (small) feature dim to a multiple of 8 for clean sublane layout.
    ninp_pad = ((ninp + 7) // 8) * 8
    if ninp_pad != ninp:
        inputs = jnp.pad(inputs, ((0, 0), (0, 0), (0, ninp_pad - ninp)))

    # ---------------- parameter prep (pure layout work, outside the kernel) ------------
    def pad_gate_cols(w):  # (r, 2n) -> (r, 2*npad): pad each gate half to npad columns
        return jnp.concatenate(
            [jnp.pad(w[:, :n], ((0, 0), (0, pad_n))),
             jnp.pad(w[:, n:], ((0, 0), (0, pad_n)))], axis=-1)

    w0f = w0.astype(jnp.float32)
    wsf = ws.astype(jnp.float32)
    w0x = jnp.pad(pad_gate_cols(w0f[:ninp, :]), ((0, ninp_pad - ninp), (0, 0)))   # (ninp_pad, 2*npad)
    w0h = jnp.pad(pad_gate_cols(w0f[ninp:, :]), ((0, pad_n), (0, 0)))             # (npad, 2*npad)
    ws_p = jnp.stack([jnp.pad(pad_gate_cols(wsf[i]), ((0, pad_n), (0, 0)))
                      for i in range(steps)], axis=0)                             # (S, npad, 2*npad)
    ws_flat = jnp.transpose(ws_p, (1, 0, 2)).reshape(npad, steps * 2 * npad)

    w0x_k = w0x.astype(param_dtype)
    w0h_k = w0h.astype(param_dtype)
    ws_k = ws_flat.astype(param_dtype)

    h_init = jnp.pad(hidden[0].astype(jnp.float32), ((0, 0), (0, pad_n)))         # (B, npad)

    # ---------------- tiling ----------------
    if b_tile is None:
        b_tile = _default_b_tile(B)
    assert B % b_tile == 0 and (b_tile == B or b_tile % 8 == 0)

    if t_tile is None:
        # Amortize per-grid-step overhead; bound streamed (input+output) block bytes.
        out_bytes = jnp.dtype(out_dtype).itemsize
        in_bytes = jnp.dtype(inputs.dtype).itemsize
        stream_bytes_per_t = b_tile * (npad * out_bytes + ninp_pad * in_bytes)
        t_tile = int(max(1, min(T, 32, (4 << 20) // max(stream_bytes_per_t, 1))))

    # Pad T at the end so the grid divides evenly; causal recurrence -> harmless.
    T_pad = ((T + t_tile - 1) // t_tile) * t_tile
    if T_pad != T:
        inputs = jnp.pad(inputs, ((0, T_pad - T), (0, 0), (0, 0)))

    grid = (B // b_tile, T_pad // t_tile)        # (batch blocks, time blocks)
    groups = _same_pred_groups(arch, steps)

    kernel = functools.partial(
        _nao_cell_kernel, npad=npad, steps=steps, arch=tuple(arch),
        groups=groups, t_tile=t_tile, compute_dtype=param_dtype)

    out = pl.pallas_call(
        kernel,
        out_shape=jax.ShapeDtypeStruct((T_pad, B, npad), out_dtype),
        grid=grid,
        in_specs=[
            pl.BlockSpec((t_tile, b_tile, ninp_pad), lambda bb, tt: (tt, bb, 0)),  # raw x
            pl.BlockSpec((b_tile, npad), lambda bb, tt: (bb, 0)),                  # h_init
            pl.BlockSpec(memory_space=pl.ANY),                                     # W0 (x part), HBM
            pl.BlockSpec(memory_space=pl.ANY),                                     # W0 (h part), HBM
            pl.BlockSpec(memory_space=pl.ANY),                                     # Ws (flat),  HBM
        ],
        out_specs=pl.BlockSpec((t_tile, b_tile, npad), lambda bb, tt: (tt, bb, 0)),
        scratch_shapes=[
            pltpu.VMEM((b_tile, npad), jnp.float32),                # h carry
            pltpu.VMEM((ninp_pad, 2 * npad), param_dtype),          # w0x (single buffer)
            pltpu.VMEM((npad, 2 * npad), param_dtype),              # w0h (single buffer)
            pltpu.VMEM((npad, steps * 2 * npad), param_dtype),      # Ws  (single buffer)
            pltpu.SemaphoreType.DMA((3,)),
        ],
        compiler_params=pltpu.CompilerParams(
            # batch blocks are independent (megacore / v7x 2-TC "parallel");
            # time must stay sequential ("arbitrary").
            dimension_semantics=("parallel", "arbitrary"),
            vmem_limit_bytes=_pick_vmem_limit()),
    )(inputs, h_init, w0x_k, w0h_k, ws_k)

    # Padded lanes [n:npad] / rows [T:T_pad] hold bounded garbage by design (see header
    # note); slice them off.  When npad == n and T_pad == T this slice is a no-op;
    # consumers that accept padding can take `out` directly to avoid the extra copy.
    hiddens = out[:T, :, :n]
    return hiddens, hiddens[-1][None]


# --------------------------------------------------------------------------------------
# Pure-JAX reference (eval mode), mirrors the PyTorch forward.
# --------------------------------------------------------------------------------------
def nao_cell_reference(inputs, hidden, w0, ws, *, nhid, steps=STEPS, arch=ARCH):
    def cell(h_prev, x):
        xh = jnp.concatenate([x, h_prev], axis=-1)
        ch = xh @ w0
        c0 = jax.nn.sigmoid(ch[:, :nhid])
        h0 = jnp.tanh(ch[:, nhid:])
        s0 = h_prev + c0 * (h0 - h_prev)
        states = [s0]
        for i in range(steps):
            pred, act = arch[2 * i], arch[2 * i + 1]
            s_prev = states[pred]
            chh = s_prev @ ws[i]
            c = jax.nn.sigmoid(chh[:, :nhid])
            h = _ACT_FNS[act](chh[:, nhid:])
            states.append(s_prev + c * (h - s_prev))
        out = jnp.mean(jnp.stack(states[1:steps + 1], -1), -1)
        return out, out

    _, hiddens = lax.scan(cell, hidden[0], inputs)
    return hiddens, hiddens[-1][None]


if __name__ == "__main__":
    T, B, NINP, NHID = 8, 16, 32, 32

    key = jax.random.PRNGKey(0)
    k_x, k_h, k_w0, k_ws = jax.random.split(key, 4)

    inputs = jax.random.normal(k_x, (T, B, NINP), dtype=jnp.float32)
    hidden = jax.random.normal(k_h, (1, B, NHID), dtype=jnp.float32)
    # Deterministic parameter init: uniform(-INITRANGE, INITRANGE), as in __init__.
    w0 = jax.random.uniform(k_w0, (NINP + NHID, 2 * NHID),
                            minval=-INITRANGE, maxval=INITRANGE, dtype=jnp.float32)
    ws = jax.random.uniform(k_ws, (STEPS, NHID, 2 * NHID),
                            minval=-INITRANGE, maxval=INITRANGE, dtype=jnp.float32)

    ref_hiddens, ref_last = nao_cell_reference(inputs, hidden, w0, ws, nhid=NHID)

    # 1) Default tiling: one full-batch block (MXU M-fill) and a single time block.
    h32, last32 = nao_cell_forward(inputs, hidden, w0, ws, nhid=NHID)
    jax.block_until_ready((h32, last32))
    assert h32.shape == (T, B, NHID) and last32.shape == (1, B, NHID)
    assert jnp.allclose(h32, ref_hiddens, atol=1e-4, rtol=1e-4)
    assert jnp.allclose(last32, ref_last, atol=1e-4, rtol=1e-4)

    # 2) Tiled-path correctness check (carry across time blocks, >1 batch block,
    #    per-block weight reload).  NOT a perf configuration — real runs keep b_tile
    #    large per _default_b_tile (128–256, or B/2 on v7x).
    h_t, last_t = nao_cell_forward(inputs, hidden, w0, ws, nhid=NHID, b_tile=8, t_tile=4)
    jax.block_until_ready((h_t, last_t))
    assert jnp.allclose(h_t, ref_hiddens, atol=1e-4, rtol=1e-4)
    assert jnp.allclose(last_t, ref_last, atol=1e-4, rtol=1e-4)

    # 3) T not divisible by t_tile -> padded-time path.
    h_p, last_p = nao_cell_forward(inputs, hidden, w0, ws, nhid=NHID, t_tile=3)
    jax.block_until_ready((h_p, last_p))
    assert jnp.allclose(h_p, ref_hiddens, atol=1e-4, rtol=1e-4)

    # 4) bf16 weights/activations into the MXU (f32 accumulation): loose check vs f32.
    h16, last16 = nao_cell_forward(inputs, hidden, w0, ws, nhid=NHID,
                                   param_dtype=jnp.bfloat16)
    jax.block_until_ready((h16, last16))
    assert jnp.allclose(h16, ref_hiddens, atol=5e-2, rtol=5e-2)
    assert jnp.allclose(last16, ref_last, atol=5e-2, rtol=5e-2)

    print("KERNEL_OK")
</pallas_src>

<mosaic_0001>
module attributes {stable_mosaic.version = 11 : i64} {
  func.func @_nao_cell_kernel(%arg0: i32, %arg1: i32, %arg2: memref<8x16x32xf32, #tpu.memory_space<vmem>>, %arg3: memref<16x128xf32, #tpu.memory_space<vmem>>, %arg4: memref<32x256xf32, #tpu.memory_space<any>>, %arg5: memref<128x256xf32, #tpu.memory_space<any>>, %arg6: memref<128x2048xf32, #tpu.memory_space<any>>, %arg7: memref<8x16x128xf32, #tpu.memory_space<vmem>>, %arg8: memref<16x128xf32, #tpu.memory_space<vmem>>, %arg9: memref<32x256xf32, #tpu.memory_space<vmem>>, %arg10: memref<128x256xf32, #tpu.memory_space<vmem>>, %arg11: memref<128x2048xf32, #tpu.memory_space<vmem>>, %arg12: memref<3x!tpu.dma_semaphore, #tpu.memory_space<semaphore_mem>>) attributes {dimension_semantics = [#tpu.dimension_semantics<parallel>, #tpu.dimension_semantics<arbitrary>], iteration_bounds = array<i64: 1, 1>, scalar_prefetch = 0 : i64, scratch_operands = 5 : i64, tpu.core_type = #tpu.core_type<tc>, window_params = [{transform_indices = @transform_0, window_bounds = array<i64: 8, 16, 32>}, {transform_indices = @transform_1, window_bounds = array<i64: 16, 128>}, {}, {}, {}, {transform_indices = @transform_5, window_bounds = array<i64: 8, 16, 128>}]} {
    %c0_i32 = arith.constant 0 : i32
    %0 = arith.cmpi eq, %arg1, %c0_i32 : i32
    %1 = arith.extui %0 : i1 to i32
    %c0_i32_0 = arith.constant 0 : i32
    %2 = arith.cmpi ne, %1, %c0_i32_0 : i32
    scf.if %2 {
      %c0_i32_10 = arith.constant 0 : i32
      %9 = tpu.memref_slice %arg12[%c0_i32_10] : memref<3x!tpu.dma_semaphore, #tpu.memory_space<semaphore_mem>> -> memref<1x!tpu.dma_semaphore, #tpu.memory_space<semaphore_mem>>
      %10 = tpu.memref_squeeze %9 : memref<1x!tpu.dma_semaphore, #tpu.memory_space<semaphore_mem>> -> memref<!tpu.dma_semaphore, #tpu.memory_space<semaphore_mem>>
      tpu.enqueue_dma source(%arg4 : memref<32x256xf32, #tpu.memory_space<any>>) target(%arg9 : memref<32x256xf32, #tpu.memory_space<vmem>>) target_semaphore(%10 : memref<!tpu.dma_semaphore, #tpu.memory_space<semaphore_mem>>)
      %c1_i32_11 = arith.constant 1 : i32
      %11 = tpu.memref_slice %arg12[%c1_i32_11] : memref<3x!tpu.dma_semaphore, #tpu.memory_space<semaphore_mem>> -> memref<1x!tpu.dma_semaphore, #tpu.memory_space<semaphore_mem>>
      %12 = tpu.memref_squeeze %11 : memref<1x!tpu.dma_semaphore, #tpu.memory_space<semaphore_mem>> -> memref<!tpu.dma_semaphore, #tpu.memory_space<semaphore_mem>>
      tpu.enqueue_dma source(%arg5 : memref<128x256xf32, #tpu.memory_space<any>>) target(%arg10 : memref<128x256xf32, #tpu.memory_space<vmem>>) target_semaphore(%12 : memref<!tpu.dma_semaphore, #tpu.memory_space<semaphore_mem>>)
      %c2_i32 = arith.constant 2 : i32
      %13 = tpu.memref_slice %arg12[%c2_i32] : memref<3x!tpu.dma_semaphore, #tpu.memory_space<semaphore_mem>> -> memref<1x!tpu.dma_semaphore, #tpu.memory_space<semaphore_mem>>
      %14 = tpu.memref_squeeze %13 : memref<1x!tpu.dma_semaphore, #tpu.memory_space<semaphore_mem>> -> memref<!tpu.dma_semaphore, #tpu.memory_space<semaphore_mem>>
      tpu.enqueue_dma source(%arg6 : memref<128x2048xf32, #tpu.memory_space<any>>) target(%arg11 : memref<128x2048xf32, #tpu.memory_space<vmem>>) target_semaphore(%14 : memref<!tpu.dma_semaphore, #tpu.memory_space<semaphore_mem>>)
      %c0_i32_12 = arith.constant 0 : i32
      %15 = tpu.memref_slice %arg12[%c0_i32_12] : memref<3x!tpu.dma_semaphore, #tpu.memory_space<semaphore_mem>> -> memref<1x!tpu.dma_semaphore, #tpu.memory_space<semaphore_mem>>
      %16 = tpu.memref_squeeze %15 : memref<1x!tpu.dma_semaphore, #tpu.memory_space<semaphore_mem>> -> memref<!tpu.dma_semaphore, #tpu.memory_space<semaphore_mem>>
      tpu.wait_dma2 semaphore(%16 : memref<!tpu.dma_semaphore, #tpu.memory_space<semaphore_mem>>) src(%arg4 : memref<32x256xf32, #tpu.memory_space<any>>) dst(%arg9 : memref<32x256xf32, #tpu.memory_space<vmem>>)
      %c1_i32_13 = arith.constant 1 : i32
      %17 = tpu.memref_slice %arg12[%c1_i32_13] : memref<3x!tpu.dma_semaphore, #tpu.memory_space<semaphore_mem>> -> memref<1x!tpu.dma_semaphore, #tpu.memory_space<semaphore_mem>>
      %18 = tpu.memref_squeeze %17 : memref<1x!tpu.dma_semaphore, #tpu.memory_space<semaphore_mem>> -> memref<!tpu.dma_semaphore, #tpu.memory_space<semaphore_mem>>
      tpu.wait_dma2 semaphore(%18 : memref<!tpu.dma_semaphore, #tpu.memory_space<semaphore_mem>>) src(%arg5 : memref<128x256xf32, #tpu.memory_space<any>>) dst(%arg10 : memref<128x256xf32, #tpu.memory_space<vmem>>)
      %c2_i32_14 = arith.constant 2 : i32
      %19 = tpu.memref_slice %arg12[%c2_i32_14] : memref<3x!tpu.dma_semaphore, #tpu.memory_space<semaphore_mem>> -> memref<1x!tpu.dma_semaphore, #tpu.memory_space<semaphore_mem>>
      %20 = tpu.memref_squeeze %19 : memref<1x!tpu.dma_semaphore, #tpu.memory_space<semaphore_mem>> -> memref<!tpu.dma_semaphore, #tpu.memory_space<semaphore_mem>>
      tpu.wait_dma2 semaphore(%20 : memref<!tpu.dma_semaphore, #tpu.memory_space<semaphore_mem>>) src(%arg6 : memref<128x2048xf32, #tpu.memory_space<any>>) dst(%arg11 : memref<128x2048xf32, #tpu.memory_space<vmem>>)
      %c0_15 = arith.constant 0 : index
      %c0_16 = arith.constant 0 : index
      %21 = vector.load %arg3[%c0_15, %c0_16] : memref<16x128xf32, #tpu.memory_space<vmem>>, vector<16x128xf32>
      %c0_17 = arith.constant 0 : index
      %c0_18 = arith.constant 0 : index
      %22 = vector.load %arg8[%c0_17, %c0_18] : memref<16x128xf32, #tpu.memory_space<vmem>>, vector<16x128xf32>
      tpu.vector_store %arg8[%c0_17, %c0_18], %21 {strides = array<i32>} : memref<16x128xf32, #tpu.memory_space<vmem>>, vector<16x128xf32>,
    } else {
    }
    %c0 = arith.constant 0 : index
    %c0_1 = arith.constant 0 : index
    %3 = vector.load %arg9[%c0, %c0_1] : memref<32x256xf32, #tpu.memory_space<vmem>>, vector<32x256xf32>
    %c0_2 = arith.constant 0 : index
    %c0_3 = arith.constant 0 : index
    %4 = vector.load %arg10[%c0_2, %c0_3] : memref<128x256xf32, #tpu.memory_space<vmem>>, vector<128x256xf32>
    %c0_4 = arith.constant 0 : index
    %c0_5 = arith.constant 0 : index
    %5 = vector.load %arg8[%c0_4, %c0_5] : memref<16x128xf32, #tpu.memory_space<vmem>>, vector<16x128xf32>
    %c0_i32_6 = arith.constant 0 : i32
    %c8_i32 = arith.constant 8 : i32
    %6 = arith.addi %c0_i32_6, %c8_i32 : i32
    %c1_i32 = arith.constant 1 : i32
    %7 = scf.for %arg13 = %c0_i32_6 to %6 step %c1_i32 iter_args(%arg14 = %5) -> (vector<16x128xf32>)  : i32 {
      %9 = arith.index_cast %arg13 : i32 to index
      %c0_10 = arith.constant 0 : index
      %c0_11 = arith.constant 0 : index
      %10 = vector.load %arg2[%9, %c0_10, %c0_11] : memref<8x16x32xf32, #tpu.memory_space<vmem>>, vector<1x16x32xf32>
      %11 = vector.shape_cast %10 : vector<1x16x32xf32> to vector<16x32xf32>
      %cst = arith.constant dense<0.000000e+00> : vector<16x256xf32>
      %12 = tpu.matmul %11, %3, %cst {dimension_numbers = #tpu.dot_dimension_numbers<[1], [0], [0], [1], [0, 0, 1, 1], [], []>} : vector<16x32xf32>, vector<32x256xf32>, vector<16x256xf32> -> vector<16x256xf32>
      %cst_12 = arith.constant dense<0.000000e+00> : vector<16x256xf32>
      %13 = tpu.matmul %arg14, %4, %cst_12 {dimension_numbers = #tpu.dot_dimension_numbers<[1], [0], [0], [1], [0, 0, 1, 1], [], []>} : vector<16x128xf32>, vector<128x256xf32>, vector<16x256xf32> -> vector<16x256xf32>
      %14 = arith.addf %12, %13 : vector<16x256xf32>
      %15 = vector.extract_strided_slice %14 {offsets = [0, 0], sizes = [16, 128], strides = [1, 1]} : vector<16x256xf32> to vector<16x128xf32>
      %16 = arith.negf %15 : vector<16x128xf32>
      %17 = math.exp %16 : vector<16x128xf32>
      %cst_13 = arith.constant 1.000000e+00 : f32
      %18 = vector.broadcast %cst_13 : f32 to vector<16x128xf32>
      %19 = arith.addf %18, %17 : vector<16x128xf32>
      %20 = arith.divf %18, %19 : vector<16x128xf32>
      %21 = vector.extract_strided_slice %14 {offsets = [0, 128], sizes = [16, 128], strides = [1, 1]} : vector<16x256xf32> to vector<16x128xf32>
      %22 = math.tanh %21 : vector<16x128xf32>
      %23 = arith.subf %22, %arg14 : vector<16x128xf32>
      %24 = arith.mulf %20, %23 : vector<16x128xf32>
      %25 = arith.addf %arg14, %24 : vector<16x128xf32>
      %cst_14 = arith.constant 0.000000e+00 : f32
      %26 = vector.broadcast %cst_14 : f32 to vector<16x128xf32>
      %c0_15 = arith.constant 0 : index
      %c0_16 = arith.constant 0 : index
      %27 = vector.load %arg11[%c0_15, %c0_16] : memref<128x2048xf32, #tpu.memory_space<vmem>>, vector<128x512xf32>
      %cst_17 = arith.constant dense<0.000000e+00> : vector<16x512xf32>
      %28 = tpu.matmul %25, %27, %cst_17 {dimension_numbers = #tpu.dot_dimension_numbers<[1], [0], [0], [1], [0, 0, 1, 1], [], []>} : vector<16x128xf32>, vector<128x512xf32>, vector<16x512xf32> -> vector<16x512xf32>
      %29 = vector.extract_strided_slice %28 {offsets = [0, 0], sizes = [16, 128], strides = [1, 1]} : vector<16x512xf32> to vector<16x128xf32>
      %30 = arith.negf %29 : vector<16x128xf32>
      %31 = math.exp %30 : vector<16x128xf32>
      %cst_18 = arith.constant 1.000000e+00 : f32
      %32 = vector.broadcast %cst_18 : f32 to vector<16x128xf32>
      %33 = arith.addf %32, %31 : vector<16x128xf32>
      %34 = arith.divf %32, %33 : vector<16x128xf32>
      %35 = vector.extract_strided_slice %28 {offsets = [0, 128], sizes = [16, 128], strides = [1, 1]} : vector<16x512xf32> to vector<16x128xf32>
      %36 = math.tanh %35 : vector<16x128xf32>
      %37 = arith.subf %36, %25 : vector<16x128xf32>
      %38 = arith.mulf %34, %37 : vector<16x128xf32>
      %39 = arith.addf %25, %38 : vector<16x128xf32>
      %40 = arith.addf %26, %39 : vector<16x128xf32>
      %41 = vector.extract_strided_slice %28 {offsets = [0, 256], sizes = [16, 128], strides = [1, 1]} : vector<16x512xf32> to vector<16x128xf32>
      %42 = arith.negf %41 : vector<16x128xf32>
      %43 = math.exp %42 : vector<16x128xf32>
      %cst_19 = arith.constant 1.000000e+00 : f32
      %44 = vector.broadcast %cst_19 : f32 to vector<16x128xf32>
      %45 = arith.addf %44, %43 : vector<16x128xf32>
      %46 = arith.divf %44, %45 : vector<16x128xf32>
      %47 = vector.extract_strided_slice %28 {offsets = [0, 384], sizes = [16, 128], strides = [1, 1]} : vector<16x512xf32> to vector<16x128xf32>
      %cst_20 = arith.constant 0.000000e+00 : f32
      %48 = vector.broadcast %cst_20 : f32 to vector<16x128xf32>
      %49 = arith.maximumf %47, %48 : vector<16x128xf32>
      %50 = arith.subf %49, %25 : vector<16x128xf32>
      %51 = arith.mulf %46, %50 : vector<16x128xf32>
      %52 = arith.addf %25, %51 : vector<16x128xf32>
      %53 = arith.addf %40, %52 : vector<16x128xf32>
      %c0_21 = arith.constant 0 : index
      %c512 = arith.constant 512 : index
      %54 = vector.load %arg11[%c0_21, %c512] : memref<128x2048xf32, #tpu.memory_space<vmem>>, vector<128x512xf32>
      %cst_22 = arith.constant dense<0.000000e+00> : vector<16x512xf32>
      %55 = tpu.matmul %39, %54, %cst_22 {dimension_numbers = #tpu.dot_dimension_numbers<[1], [0], [0], [1], [0, 0, 1, 1], [], []>} : vector<16x128xf32>, vector<128x512xf32>, vector<16x512xf32> -> vector<16x512xf32>
      %56 = vector.extract_strided_slice %55 {offsets = [0, 0], sizes = [16, 128], strides = [1, 1]} : vector<16x512xf32> to vector<16x128xf32>
      %57 = arith.negf %56 : vector<16x128xf32>
      %58 = math.exp %57 : vector<16x128xf32>
      %cst_23 = arith.constant 1.000000e+00 : f32
      %59 = vector.broadcast %cst_23 : f32 to vector<16x128xf32>
      %60 = arith.addf %59, %58 : vector<16x128xf32>
      %61 = arith.divf %59, %60 : vector<16x128xf32>
      %62 = vector.extract_strided_slice %55 {offsets = [0, 128], sizes = [16, 128], strides = [1, 1]} : vector<16x512xf32> to vector<16x128xf32>
      %63 = arith.negf %62 : vector<16x128xf32>
      %64 = math.exp %63 : vector<16x128xf32>
      %cst_24 = arith.constant 1.000000e+00 : f32
      %65 = vector.broadcast %cst_24 : f32 to vector<16x128xf32>
      %66 = arith.addf %65, %64 : vector<16x128xf32>
      %67 = arith.divf %65, %66 : vector<16x128xf32>
      %68 = arith.subf %67, %39 : vector<16x128xf32>
      %69 = arith.mulf %61, %68 : vector<16x128xf32>
      %70 = arith.addf %39, %69 : vector<16x128xf32>
      %71 = arith.addf %53, %70 : vector<16x128xf32>
      %72 = vector.extract_strided_slice %55 {offsets = [0, 256], sizes = [16, 128], strides = [1, 1]} : vector<16x512xf32> to vector<16x128xf32>
      %73 = arith.negf %72 : vector<16x128xf32>
      %74 = math.exp %73 : vector<16x128xf32>
      %cst_25 = arith.constant 1.000000e+00 : f32
      %75 = vector.broadcast %cst_25 : f32 to vector<16x128xf32>
      %76 = arith.addf %75, %74 : vector<16x128xf32>
      %77 = arith.divf %75, %76 : vector<16x128xf32>
      %78 = vector.extract_strided_slice %55 {offsets = [0, 384], sizes = [16, 128], strides = [1, 1]} : vector<16x512xf32> to vector<16x128xf32>
      %79 = math.tanh %78 : vector<16x128xf32>
      %80 = arith.subf %79, %39 : vector<16x128xf32>
      %81 = arith.mulf %77, %80 : vector<16x128xf32>
      %82 = arith.addf %39, %81 : vector<16x128xf32>
      %83 = arith.addf %71, %82 : vector<16x128xf32>
      %c0_26 = arith.constant 0 : index
      %c1024 = arith.constant 1024 : index
      %84 = vector.load %arg11[%c0_26, %c1024] : memref<128x2048xf32, #tpu.memory_space<vmem>>, vector<128x256xf32>
      %cst_27 = arith.constant dense<0.000000e+00> : vector<16x256xf32>
      %85 = tpu.matmul %52, %84, %cst_27 {dimension_numbers = #tpu.dot_dimension_numbers<[1], [0], [0], [1], [0, 0, 1, 1], [], []>} : vector<16x128xf32>, vector<128x256xf32>, vector<16x256xf32> -> vector<16x256xf32>
      %86 = vector.extract_strided_slice %85 {offsets = [0, 0], sizes = [16, 128], strides = [1, 1]} : vector<16x256xf32> to vector<16x128xf32>
      %87 = arith.negf %86 : vector<16x128xf32>
      %88 = math.exp %87 : vector<16x128xf32>
      %cst_28 = arith.constant 1.000000e+00 : f32
      %89 = vector.broadcast %cst_28 : f32 to vector<16x128xf32>
      %90 = arith.addf %89, %88 : vector<16x128xf32>
      %91 = arith.divf %89, %90 : vector<16x128xf32>
      %92 = vector.extract_strided_slice %85 {offsets = [0, 128], sizes = [16, 128], strides = [1, 1]} : vector<16x256xf32> to vector<16x128xf32>
      %93 = arith.subf %92, %52 : vector<16x128xf32>
      %94 = arith.mulf %91, %93 : vector<16x128xf32>
      %95 = arith.addf %52, %94 : vector<16x128xf32>
      %96 = arith.addf %83, %95 : vector<16x128xf32>
      %c0_29 = arith.constant 0 : index
      %c1280 = arith.constant 1280 : index
      %97 = vector.load %arg11[%c0_29, %c1280] : memref<128x2048xf32, #tpu.memory_space<vmem>>, vector<128x256xf32>
      %cst_30 = arith.constant dense<0.000000e+00> : vector<16x256xf32>
      %98 = tpu.matmul %70, %97, %cst_30 {dimension_numbers = #tpu.dot_dimension_numbers<[1], [0], [0], [1], [0, 0, 1, 1], [], []>} : vector<16x128xf32>, vector<128x256xf32>, vector<16x256xf32> -> vector<16x256xf32>
      %99 = vector.extract_strided_slice %98 {offsets = [0, 0], sizes = [16, 128], strides = [1, 1]} : vector<16x256xf32> to vector<16x128xf32>
      %100 = arith.negf %99 : vector<16x128xf32>
      %101 = math.exp %100 : vector<16x128xf32>
      %cst_31 = arith.constant 1.000000e+00 : f32
      %102 = vector.broadcast %cst_31 : f32 to vector<16x128xf32>
      %103 = arith.addf %102, %101 : vector<16x128xf32>
      %104 = arith.divf %102, %103 : vector<16x128xf32>
      %105 = vector.extract_strided_slice %98 {offsets = [0, 128], sizes = [16, 128], strides = [1, 1]} : vector<16x256xf32> to vector<16x128xf32>
      %cst_32 = arith.constant 0.000000e+00 : f32
      %106 = vector.broadcast %cst_32 : f32 to vector<16x128xf32>
      %107 = arith.maximumf %105, %106 : vector<16x128xf32>
      %108 = arith.subf %107, %70 : vector<16x128xf32>
      %109 = arith.mulf %104, %108 : vector<16x128xf32>
      %110 = arith.addf %70, %109 : vector<16x128xf32>
      %111 = arith.addf %96, %110 : vector<16x128xf32>
      %c0_33 = arith.constant 0 : index
      %c1536 = arith.constant 1536 : index
      %112 = vector.load %arg11[%c0_33, %c1536] : memref<128x2048xf32, #tpu.memory_space<vmem>>, vector<128x256xf32>
      %cst_34 = arith.constant dense<0.000000e+00> : vector<16x256xf32>
      %113 = tpu.matmul %82, %112, %cst_34 {dimension_numbers = #tpu.dot_dimension_numbers<[1], [0], [0], [1], [0, 0, 1, 1], [], []>} : vector<16x128xf32>, vector<128x256xf32>, vector<16x256xf32> -> vector<16x256xf32>
      %114 = vector.extract_strided_slice %113 {offsets = [0, 0], sizes = [16, 128], strides = [1, 1]} : vector<16x256xf32> to vector<16x128xf32>
      %115 = arith.negf %114 : vector<16x128xf32>
      %116 = math.exp %115 : vector<16x128xf32>
      %cst_35 = arith.constant 1.000000e+00 : f32
      %117 = vector.broadcast %cst_35 : f32 to vector<16x128xf32>
      %118 = arith.addf %117, %116 : vector<16x128xf32>
      %119 = arith.divf %117, %118 : vector<16x128xf32>
      %120 = vector.extract_strided_slice %113 {offsets = [0, 128], sizes = [16, 128], strides = [1, 1]} : vector<16x256xf32> to vector<16x128xf32>
      %121 = arith.negf %120 : vector<16x128xf32>
      %122 = math.exp %121 : vector<16x128xf32>
      %cst_36 = arith.constant 1.000000e+00 : f32
      %123 = vector.broadcast %cst_36 : f32 to vector<16x128xf32>
      %124 = arith.addf %123, %122 : vector<16x128xf32>
      %125 = arith.divf %123, %124 : vector<16x128xf32>
      %126 = arith.subf %125, %82 : vector<16x128xf32>
      %127 = arith.mulf %119, %126 : vector<16x128xf32>
      %128 = arith.addf %82, %127 : vector<16x128xf32>
      %129 = arith.addf %111, %128 : vector<16x128xf32>
      %c0_37 = arith.constant 0 : index
      %c1792 = arith.constant 1792 : index
      %130 = vector.load %arg11[%c0_37, %c1792] : memref<128x2048xf32, #tpu.memory_space<vmem>>, vector<128x256xf32>
      %cst_38 = arith.constant dense<0.000000e+00> : vector<16x256xf32>
      %131 = tpu.matmul %95, %130, %cst_38 {dimension_numbers = #tpu.dot_dimension_numbers<[1], [0], [0], [1], [0, 0, 1, 1], [], []>} : vector<16x128xf32>, vector<128x256xf32>, vector<16x256xf32> -> vector<16x256xf32>
      %132 = vector.extract_strided_slice %131 {offsets = [0, 0], sizes = [16, 128], strides = [1, 1]} : vector<16x256xf32> to vector<16x128xf32>
      %133 = arith.negf %132 : vector<16x128xf32>
      %134 = math.exp %133 : vector<16x128xf32>
      %cst_39 = arith.constant 1.000000e+00 : f32
      %135 = vector.broadcast %cst_39 : f32 to vector<16x128xf32>
      %136 = arith.addf %135, %134 : vector<16x128xf32>
      %137 = arith.divf %135, %136 : vector<16x128xf32>
      %138 = vector.extract_strided_slice %131 {offsets = [0, 128], sizes = [16, 128], strides = [1, 1]} : vector<16x256xf32> to vector<16x128xf32>
      %139 = math.tanh %138 : vector<16x128xf32>
      %140 = arith.subf %139, %95 : vector<16x128xf32>
      %141 = arith.mulf %137, %140 : vector<16x128xf32>
      %142 = arith.addf %95, %141 : vector<16x128xf32>
      %143 = arith.addf %129, %142 : vector<16x128xf32>
      %cst_40 = arith.constant 1.250000e-01 : f32
      %144 = vector.broadcast %cst_40 : f32 to vector<16x128xf32>
      %145 = arith.mulf %143, %144 : vector<16x128xf32>
      %146 = arith.index_cast %arg13 : i32 to index
      %c0_41 = arith.constant 0 : index
      %c0_42 = arith.constant 0 : index
      %147 = vector.load %arg7[%146, %c0_41, %c0_42] : memref<8x16x128xf32, #tpu.memory_space<vmem>>, vector<1x16x128xf32>
      %148 = vector.shape_cast %147 : vector<1x16x128xf32> to vector<16x128xf32>
      %149 = vector.shape_cast %145 : vector<16x128xf32> to vector<1x16x128xf32>
      tpu.vector_store %arg7[%146, %c0_41, %c0_42], %149 {strides = array<i32>} : memref<8x16x128xf32, #tpu.memory_space<vmem>>, vector<1x16x128xf32>,
      scf.yield %145 : vector<16x128xf32>
    }
    %c8_i32_7 = arith.constant 8 : i32
    %c0_8 = arith.constant 0 : index
    %c0_9 = arith.constant 0 : index
    %8 = vector.load %arg8[%c0_8, %c0_9] : memref<16x128xf32, #tpu.memory_space<vmem>>, vector<16x128xf32>
    tpu.vector_store %arg8[%c0_8, %c0_9], %7 {strides = array<i32>} : memref<16x128xf32, #tpu.memory_space<vmem>>, vector<16x128xf32>,
    return
  }
  func.func @transform_0(%arg0: i32, %arg1: i32) -> (i32, i32, i32) {
    %c0_i32 = arith.constant 0 : i32
    %c0_i32_0 = arith.constant 0 : i32
    return %arg1, %arg0, %c0_i32 : i32, i32, i32
  }
  func.func @transform_1(%arg0: i32, %arg1: i32) -> (i32, i32) {
    %c0_i32 = arith.constant 0 : i32
    %c0_i32_0 = arith.constant 0 : i32
    return %arg0, %c0_i32 : i32, i32
  }
  func.func @transform_5(%arg0: i32, %arg1: i32) -> (i32, i32, i32) {
    %c0_i32 = arith.constant 0 : i32
    %c0_i32_0 = arith.constant 0 : i32
    return %arg1, %arg0, %c0_i32 : i32, i32, i32
  }
}

</mosaic_0001>

<bundles_post_ra>
// kernel: tpu_custom_call.1
= control target key start
LH: loop header
LB: loop body
LE: loop exit
PB: predicated region body
PF: predicated region fallthrough
CT: control target
= control target key end

     0   :  { %10 = vsyncpa [#allocation8], 0  ;;  %s2475_s0 = inlined_call_operand.hbm [shape: f32[8,16,32], index: 0, kind: input, shape index: {}]   ;;  %s2476_s1 = inlined_call_operand.hbm [shape: f32[16,128], index: 1, kind: input, shape index: {}]   ;;  %s2477_s2 = inlined_call_operand.hbm [shape: f32[32,256], index: 2, kind: input, shape index: {}]   ;;  %s2478_s3 = inlined_call_operand.hbm [shape: f32[128,256], index: 3, kind: input, shape index: {}]   ;;  %s2479_s4 = inlined_call_operand.hbm [shape: f32[128,2048], index: 4, kind: input, shape index: {}]   ;;  %s2480_s5 = inlined_call_operand.hbm [shape: f32[8,16,128], index: 5, kind: output, shape index: {}]  }
   0x1   :  { %11 = vsyncpa [#allocation11], 0 }
   0x2   :  { %12 = vsyncpa [#allocation9], 0  ;;  %s2091_s18 = smov [#allocation7]   ;;  %s1923_s22 = scalar_lea.hbm %s2475_s0, 2048 }
   0x3   :  { %s18_s19 = sshll.u32 %s2091_s18, 4  ;;  %p1924_p0 = scmp.ne.s32.totalorder %s2475_s0, %s1923_s22  ;;  %s19_s19 = int_to_ptr.vmem [resolvable:$true] %s18_s19 }
   0x4   :  { %p1927_p1 = scmp.lt.u32.totalorder %s1923_s22, %s2475_s0 }
   0x6   :  { %p1929_p2 = pnand %p1927_p1, %p1924_p0 }
   0x8   :  { %1932 = shalt.err (!%p1929_p2)
}
   0x9   :  { %s1933_s27 = scalar_lea.vmem %s19_s19, 2048  ;;  %p1938_p4 = scmp.lt.s32.totalorder %s19_s19, %s19_s19 }
   0xa   :  { %p1934_p3 = scmp.ne.s32.totalorder %s19_s19, %s1933_s27  ;;  %p1939_p5 = scmp.lt.s32.totalorder %s1933_s27, %s1933_s27 }
   0xc   :  { %p1940_p6 = por %p1939_p5, %p1938_p4 }
   0xe   :  { %p1941_p7 = pnand %p1940_p6, %p1934_p3 }
  0x10   :  { %1944 = shalt.err (!%p1941_p7)
}
  0x11   :  { %s2092_s28 = smov 128   ;;  %s2093_s29 = smov 8  }
  0x12   :  { %24 = dma.hbm_to_vmem [thread:$0]  %s2475_s0, 2048, %s19_s19, [#allocation8], %s2092_s28, %s2092_s28, %s2093_s29  }
  0x13   :  { %s2094_s7 = smov [#allocation10]   ;;  %s1945_s11 = scalar_lea.hbm %s2476_s1, 256 }
  0x14   :  { %s30_s8 = sshll.u32 %s2094_s7, 4  ;;  %p1946_p8 = scmp.ne.s32.totalorder %s2476_s1, %s1945_s11  ;;  %s31_s8 = int_to_ptr.vmem [resolvable:$true] %s30_s8 }
  0x15   :  { %p1949_p9 = scmp.lt.u32.totalorder %s1945_s11, %s2476_s1 }
  0x17   :  { %p1951_p10 = pnand %p1949_p9, %p1946_p8 }
  0x19   :  { %1954 = shalt.err (!%p1951_p10)
}
  0x1a   :  { %s1955_s16 = scalar_lea.vmem %s31_s8, 256  ;;  %p1960_p12 = scmp.lt.s32.totalorder %s31_s8, %s31_s8 }
  0x1b   :  { %p1956_p11 = scmp.ne.s32.totalorder %s31_s8, %s1955_s16  ;;  %p1961_p13 = scmp.lt.s32.totalorder %s1955_s16, %s1955_s16 }
  0x1d   :  { %p1962_p0 = por %p1961_p13, %p1960_p12 }
  0x1f   :  { %p1963_p1 = pnand %p1962_p0, %p1956_p11 }
  0x21   :  { %1966 = shalt.err (!%p1963_p1)
}
  0x22   :  { %36 = dma.hbm_to_vmem [thread:$0]  %s2476_s1, 256, %s31_s8, [#allocation11], %s2092_s28, %s2092_s28, %s2093_s29  }
  0x23   :  { %2067 = dma.done.wait [#allocation8], 2048  }
  0x24   :  { %2068 = vsyncadd [#allocation8], 4294965248 }
  0x25   :  { %2069 = dma.done.wait [#allocation11], 256  }
  0x26   :  { %2070 = vsyncadd [#allocation11], 4294967040  ;;  %s2095_s18 = smov [#allocation3]   ;;  %s2096_s20 = smov [#allocation4]  }
  0x27   :  { %s54_s19 = sshll.u32 %s2095_s18, 4  ;;  %s66_s21 = sshll.u32 %s2096_s20, 4  ;;  %s55_s19 = int_to_ptr.vmem [resolvable:$true] %s54_s19  ;;  %s67_s21 = int_to_ptr.vmem [resolvable:$true] %s66_s21 }
  0x28   :  { %s1967_s24 = scalar_lea.hbm %s2477_s2, 1024 }
  0x29   :  { %p1968_p2 = scmp.ne.s32.totalorder %s2477_s2, %s1967_s24  ;;  %p1971_p3 = scmp.lt.u32.totalorder %s1967_s24, %s2477_s2 }
  0x2b   :  { %p1973_p4 = pnand %p1971_p3, %p1968_p2 }
  0x2d   :  { %1976 = shalt.err (!%p1973_p4)  }
  0x2e   :  { %s1977_s30 = scalar_lea.vmem %s55_s19, 1024  ;;  %p1982_p6 = scmp.lt.s32.totalorder %s55_s19, %s55_s19 }
  0x2f   :  { %p1978_p5 = scmp.ne.s32.totalorder %s55_s19, %s1977_s30  ;;  %p1983_p7 = scmp.lt.s32.totalorder %s1977_s30, %s1977_s30 }
  0x31   :  { %p1984_p8 = por %p1983_p7, %p1982_p6 }
  0x33   :  { %p1985_p9 = pnand %p1984_p8, %p1978_p5 }
  0x35   :  { %1988 = shalt.err (!%p1985_p9)  }
  0x36   :  { %57 = dma.hbm_to_vmem [thread:$0]  %s2477_s2, 1024, %s55_s19, [#allocation6] }
  0x37   :  { %s1989_s10 = scalar_lea.hbm %s2478_s3, 4096 }
  0x38   :  { %p1990_p10 = scmp.ne.s32.totalorder %s2478_s3, %s1989_s10  ;;  %p1993_p11 = scmp.lt.u32.totalorder %s1989_s10, %s2478_s3 }
  0x3a   :  { %p1995_p12 = pnand %p1993_p11, %p1990_p10 }
  0x3c   :  { %1998 = shalt.err (!%p1995_p12)  }
  0x3d   :  { %s1999_s15 = scalar_lea.vmem %s67_s21, 4096  ;;  %p2004_p0 = scmp.lt.s32.totalorder %s67_s21, %s67_s21 }
  0x3e   :  { %p2000_p13 = scmp.ne.s32.totalorder %s67_s21, %s1999_s15  ;;  %p2005_p1 = scmp.lt.s32.totalorder %s1999_s15, %s1999_s15 }
  0x40   :  { %p2006_p2 = por %p2005_p1, %p2004_p0 }
  0x42   :  { %p2007_p3 = pnand %p2006_p2, %p2000_p13 }
  0x44   :  { %2010 = shalt.err (!%p2007_p3)  }
  0x45   :  { %69 = dma.hbm_to_vmem [thread:$0]  %s2478_s3, 4096, %s67_s21, [#allocation6 + $0x1] }
  0x46   :  { %s2097_s0 = smov [#allocation5]   ;;  %s2011_s20 = scalar_lea.hbm %s2479_s4, 32768 }
  0x47   :  { %s78_s17 = sshll.u32 %s2097_s0, 4  ;;  %p2012_p4 = scmp.ne.s32.totalorder %s2479_s4, %s2011_s20  ;;  %s79_s17 = int_to_ptr.vmem [resolvable:$true] %s78_s17 }
  0x48   :  { %p2015_p5 = scmp.lt.u32.totalorder %s2011_s20, %s2479_s4 }
  0x4a   :  { %p2017_p6 = pnand %p2015_p5, %p2012_p4 }
  0x4c   :  { %2020 = shalt.err (!%p2017_p6)  }
  0x4d   :  { %s2021_s26 = scalar_lea.vmem %s79_s17, 32768  ;;  %p2026_p8 = scmp.lt.s32.totalorder %s79_s17, %s79_s17 }
  0x4e   :  { %p2022_p7 = scmp.ne.s32.totalorder %s79_s17, %s2021_s26  ;;  %p2027_p9 = scmp.lt.s32.totalorder %s2021_s26, %s2021_s26 }
  0x50   :  { %p2028_p10 = por %p2027_p9, %p2026_p8 }
  0x52   :  { %p2029_p11 = pnand %p2028_p10, %p2022_p7 }
  0x54   :  { %2032 = shalt.err (!%p2029_p11)  }
  0x55   :  { %81 = dma.hbm_to_vmem [thread:$0]  %s2479_s4, 32768, %s79_s17, [#allocation6 + $0x2] }
  0x56   :  { %2071 = dma.done.wait [#allocation6], 1024 }
  0x57   :  { %2072 = vsyncadd [#allocation6], 4294966272 }
  0x58   :  { %2073 = dma.done.wait [#allocation6 + $0x1], 4096 }
  0x59   :  { %2074 = vsyncadd [#allocation6 + $0x1], 4294963200 }
  0x5a   :  { %2075 = dma.done.wait [#allocation6 + $0x2], 32768 }
  0x5b   :  { %2076 = vsyncadd [#allocation6 + $0x2], 4294934528  ;;  %v2196_v0 = vld [vmem:[#allocation3] sm:$0xff]  ;;  %v2198_v1 = vld [vmem:[#allocation3 + $0x8] sm:$0xff]  ;;  %s2280_s4 = smov 0  }
  0x5c   :  { %2483 = vst [vmem:[#allocation27_spill] sm:$0xff] %v2196_v0  ;;  %2484 = vst [vmem:[#allocation28_spill] sm:$0xff] %v2198_v1  ;;  %v2200_v2 = vld [vmem:[#allocation3 + $0x10] sm:$0xff]  ;;  %v2202_v3 = vld [vmem:[#allocation3 + $0x18] sm:$0xff] }
  0x5d   :  { %2485 = vst [vmem:[#allocation29_spill] sm:$0xff] %v2200_v2  ;;  %2486 = vst [vmem:[#allocation30_spill] sm:$0xff] %v2202_v3  ;;  %v2204_v4 = vld [vmem:[#allocation3 + $0x20] sm:$0xff]  ;;  %v2206_v5 = vld [vmem:[#allocation3 + $0x28] sm:$0xff] }
  0x5e   :  { %2487 = vst [vmem:[#allocation31_spill] sm:$0xff] %v2204_v4  ;;  %2488 = vst [vmem:[#allocation32_spill] sm:$0xff] %v2206_v5  ;;  %v2208_v6 = vld [vmem:[#allocation3 + $0x30] sm:$0xff]  ;;  %v2210_v7 = vld [vmem:[#allocation3 + $0x38] sm:$0xff] }
  0x5f   :  { %2489 = vst [vmem:[#allocation33_spill] sm:$0xff] %v2208_v6  ;;  %2490 = vst [vmem:[#allocation34_spill] sm:$0xff] %v2210_v7  ;;  %v2212_v8 = vld [vmem:[#allocation4] sm:$0xff]  ;;  %v2214_v9 = vld [vmem:[#allocation4 + $0x8] sm:$0xff] }
  0x60   :  { %v2216_v10 = vld [vmem:[#allocation4 + $0x10] sm:$0xff]  ;;  %v2218_v11 = vld [vmem:[#allocation4 + $0x18] sm:$0xff]  ;;  %v2220_v12 = vld [vmem:[#allocation4 + $0x20] sm:$0xff] }
  0x61   :  { %v2222_v13 = vld [vmem:[#allocation4 + $0x28] sm:$0xff]  ;;  %v2224_v14 = vld [vmem:[#allocation4 + $0x30] sm:$0xff]  ;;  %v2226_v15 = vld [vmem:[#allocation4 + $0x38] sm:$0xff] }
  0x62   :  { %v2228_v16 = vld [vmem:[#allocation4 + $0x40] sm:$0xff]  ;;  %v2230_v17 = vld [vmem:[#allocation4 + $0x48] sm:$0xff]  ;;  %v2232_v18 = vld [vmem:[#allocation4 + $0x50] sm:$0xff] }
  0x63   :  { %v2234_v19 = vld [vmem:[#allocation4 + $0x58] sm:$0xff]  ;;  %v2236_v20 = vld [vmem:[#allocation4 + $0x60] sm:$0xff]  ;;  %v2238_v21 = vld [vmem:[#allocation4 + $0x68] sm:$0xff] }
  0x64   :  { %v2240_v22 = vld [vmem:[#allocation4 + $0x70] sm:$0xff]  ;;  %v2242_v23 = vld [vmem:[#allocation4 + $0x78] sm:$0xff]  ;;  %v2244_v24 = vld [vmem:[#allocation4 + $0x80] sm:$0xff] }
  0x65   :  { %v2246_v25 = vld [vmem:[#allocation4 + $0x88] sm:$0xff]  ;;  %v2248_v26 = vld [vmem:[#allocation4 + $0x90] sm:$0xff]  ;;  %v2250_v27 = vld [vmem:[#allocation4 + $0x98] sm:$0xff] }
  0x66   :  { %v2252_v28 = vld [vmem:[#allocation4 + $0xa0] sm:$0xff]  ;;  %v2254_v29 = vld [vmem:[#allocation4 + $0xa8] sm:$0xff]  ;;  %v2256_v30 = vld [vmem:[#allocation4 + $0xb0] sm:$0xff] }
  0x67   :  { %v2258_v31 = vld [vmem:[#allocation4 + $0xb8] sm:$0xff]  ;;  %v2260_v32 = vld [vmem:[#allocation4 + $0xc0] sm:$0xff]  ;;  %v2262_v33 = vld [vmem:[#allocation4 + $0xc8] sm:$0xff] }
  0x68   :  { %v2264_v34 = vld [vmem:[#allocation4 + $0xd0] sm:$0xff]  ;;  %v2266_v35 = vld [vmem:[#allocation4 + $0xd8] sm:$0xff]  ;;  %v2268_v36 = vld [vmem:[#allocation4 + $0xe0] sm:$0xff] }
  0x69   :  { %v2270_v37 = vld [vmem:[#allocation4 + $0xe8] sm:$0xff]  ;;  %v2272_v38 = vld [vmem:[#allocation4 + $0xf0] sm:$0xff]  ;;  %v2274_v39 = vld [vmem:[#allocation4 + $0xf8] sm:$0xff] }
  0x6a   :  { %v93_v40 = vld [vmem:[#allocation10] sm:$0xff]   ;;  %v94_v41 = vld [vmem:[#allocation10 + $0x8] sm:$0xff]  }
  0x6b LB: > { %v1486_v42 = vpack.c.bf16 %v2218_v11, %v2214_v9  ;;  %v1488_v43 = vpack.c.bf16 %v2216_v10, %v2212_v8  ;;  %v1490_v44 = vpack.c.bf16 %v2226_v15, %v2222_v13  ;;  %v333_v45 = vld [vmem:[#allocation5 + $0x8] sm:$0xff]  ;;  %v1492_v46 = vpack.c.bf16 %v2224_v14, %v2220_v12  ;;  %v332_v48 = vld [vmem:[#allocation5] sm:$0xff]  ;;  %v2491_v1 = vld [vmem:[#allocation28_spill] sm:$0xff]  ;;  %s1458_s27 = sshll.u32 %s2089_s4, 4  ;;  %s144_s4 = sadd.s32 1, %s2089_s4   ;;  %s2089_s4 = sphi %s2280_s4, %s144_s4   ;;  %v2085_v40 = vphi %v93_v40, %v1398_v40   ;;  %v2081_v41 = vphi %v94_v41, %v1399_v41  }
  0x6c   : > { %v337_v47 = vld [vmem:[#allocation5 + $0x88] sm:$0xff]  ;;  %v336_v49 = vld [vmem:[#allocation5 + $0x80] sm:$0xff]  ;;  %v1494_v50 = vpack.c.bf16 %v2234_v19, %v2230_v17  ;;  %v2481_v51 = vmov 0.0   ;;  %v1496_v54 = vpack.c.bf16 %v2232_v18, %v2228_v16  ;;  %v1498_v55 = vpack.c.bf16 %v2242_v23, %v2238_v21  ;;  %v2493_v0 = vld [vmem:[#allocation27_spill] sm:$0xff]  ;;  %s148_s1 = scalar_lea.vmem [#allocation7], %s1458_s27  ;;  %s1400_s30 = scalar_lea.vmem [#allocation12], %s1458_s27 }
  0x6d   : > { %1487 = vmatprep.subr.bf16.mxu0 %v1486_v42  ;;  %215 = vmatprep.mubr.f32.mxu0 %v2481_v51  ;;  %v1526_v52 = vpack.c.bf16 %v337_v47, %v333_v45  ;;  %v1528_v53 = vpack.c.bf16 %v336_v49, %v332_v48  ;;  %v1500_v56 = vpack.c.bf16 %v2240_v22, %v2236_v20  ;;  %v2492_v3 = vld [vmem:[#allocation30_spill] sm:$0xff]  ;;  %v2494_v2 = vld [vmem:[#allocation29_spill] sm:$0xff]  ;;  %v2495_v5 = vld [vmem:[#allocation32_spill] sm:$0xff]  ;;  %vm228_vm0 = vcmask 261120   ;;  %p141_p12 = scmp.ge.s32.totalorder %s144_s4, 8  }
  0x6e   : > { %1489 = vmatpush1.bf16.msra.mxu0 %v1488_v43  ;;  %460 = vmatprep.mubr.f32.mxu1 %v2481_v51  ;;  %v1502_v57 = vpack.c.bf16 %v2250_v27, %v2246_v25  ;;  %v1504_v58 = vpack.c.bf16 %v2248_v26, %v2244_v24  ;;  %v1506_v59 = vpack.c.bf16 %v2258_v31, %v2254_v29  ;;  %v2496_v7 = vld [vmem:[#allocation34_spill] sm:$0xff]  ;;  %v2497_v4 = vld [vmem:[#allocation31_spill] sm:$0xff]  ;;  %v2498_v6 = vld [vmem:[#allocation33_spill] sm:$0xff]  ;;  %s2099_s6 = smov (%p141_p12), [#allocation12]  }
  0x6f   : > { %1491 = vmatprep.subr.bf16.mxu0 %v1490_v44  ;;  %1527 = vmatprep.subr.bf16.mxu1 %v1526_v52  ;;  %v1508_v60 = vpack.c.bf16 %v2256_v30, %v2252_v28  ;;  %v1510_v61 = vpack.c.bf16 %v2266_v35, %v2262_v33  ;;  %v1512_v62 = vpack.c.bf16 %v2264_v34, %v2260_v32  ;;  %v149_v47 = vld [vmem:[%s148_s1] sm:$0xff]  ;;  %v150_v48 = vld [vmem:[%s148_s1 + $0x8] sm:$0xff]  ;;  %s1410_s7 = sshll.u32 (%p141_p12), %s2099_s6, 4  ;;  %s1411_s7 = int_to_ptr.vmem [resolvable:$true] %s1410_s7 }
  0x70   : > { %1529 = vmatpush1.bf16.msra.mxu1 %v1528_v53  ;;  %v1514_v63 = vpack.c.bf16 %v2274_v39, %v2270_v37  ;;  %v1516_v42 = vpack.c.bf16 %v2272_v38, %v2268_v36  ;;  %v1518_v43 = vpack.c.bf16 %v2492_v3, %v2491_v1  ;;  %v1520_v44 = vpack.c.bf16 %v2494_v2, %v2493_v0  ;;  %v341_v49 = vld [vmem:[#allocation5 + $0x108] sm:$0xff]  ;;  %v340_v53 = vld [vmem:[#allocation5 + $0x100] sm:$0xff]  ;;  %v1282_v3 = vld [vmem:[#allocation5 + $0x3f8] sm:$0xff]  ;;  %s2033_s8 = scalar_lea.vmem (%p141_p12), %s1411_s7, 2048  ;;  %p2038_p0 = scmp.lt.s32.totalorder (%p141_p12), %s1411_s7, %s1411_s7 }
  0x71   : > { %v1522_v45 = vpack.c.bf16 %v2496_v7, %v2495_v5  ;;  %v893_v2 = vld [vmem:[#allocation5 + $0x6c8] sm:$0xff]  ;;  %v1288_v5 = vld [vmem:[#allocation5 + $0x578] sm:$0xff]  ;;  %p2034_p13 = scmp.ne.s32.totalorder (%p141_p12), %s1411_s7, %s2033_s8  ;;  %p2039_p1 = scmp.lt.s32.totalorder (%p141_p12), %s2033_s8, %s2033_s8 }
  0x72   : > { %1493 = vmatpush1.bf16.msra.mxu0 %v1492_v46  ;;  %v1524_v46 = vpack.c.bf16 %v2498_v6, %v2497_v4  ;;  %v1285_v4 = vld [vmem:[#allocation5 + $0x4f0] sm:$0xff]  ;;  %v1290_v6 = vld [vmem:[#allocation5 + $0x5f8] sm:$0xff] }
  0x73   : > { %1495 = vmatprep.subr.bf16.mxu0 %v1494_v50  ;;  %v345_v50 = vld [vmem:[#allocation5 + $0x188] sm:$0xff]  ;;  %v1292_v7 = vld [vmem:[#allocation5 + $0x678] sm:$0xff]  ;;  %p2040_p2 = por (%p141_p12), %p2039_p1, %p2038_p0 }
  0x74   : > { %v1530_v52 = vpack.c.bf16 %v345_v50, %v341_v49  ;;  %v364_v49 = vld [vmem:[#allocation5 + $0x400] sm:$0xff] }
  0x75   : > { %v368_v50 = vld [vmem:[#allocation5 + $0x480] sm:$0xff]  ;;  %p2041_p3 = pnand (%p141_p12), %p2040_p2, %p2034_p13 }
  0x76   : > { %1497 = vmatpush1.bf16.msra.mxu0 %v1496_v54  ;;  %v344_v54 = vld [vmem:[#allocation5 + $0x180] sm:$0xff]  ;;  %1531 = vmatprep.subr.bf16.mxu1 %v1530_v52  ;;  %v1544_v52 = vpack.c.bf16 %v368_v50, %v364_v49  ;;  %v335_v49 = vld [vmem:[#allocation5 + $0x18] sm:$0xff] }
  0x77   : > { %1499 = vmatprep.subr.bf16.mxu0 %v1498_v55  ;;  %v1532_v55 = vpack.c.bf16 %v344_v54, %v340_v53  ;;  %v373_v53 = vld [vmem:[#allocation5 + $0x508] sm:$0xff]  ;;  %v339_v50 = vld [vmem:[#allocation5 + $0x98] sm:$0xff] }
  0x78   : > { %v377_v54 = vld [vmem:[#allocation5 + $0x588] sm:$0xff] }
  0x79   : > { %1533 = vmatpush1.bf16.msra.mxu1 %v1532_v55  ;;  %v1546_v55 = vpack.c.bf16 %v377_v54, %v373_v53  ;;  %v595_v53 = vld [vmem:[#allocation5 + $0x28] sm:$0xff] }
  0x7a   : > { %1501 = vmatpush1.bf16.msra.mxu0 %v1500_v56  ;;  %v349_v56 = vld [vmem:[#allocation5 + $0x208] sm:$0xff] }
  0x7b   : > { %1503 = vmatprep.subr.bf16.mxu0 %v1502_v57  ;;  %v353_v57 = vld [vmem:[#allocation5 + $0x288] sm:$0xff] }
  0x7c   : > { %v599_v54 = vld [vmem:[#allocation5 + $0xa8] sm:$0xff] }
  0x7e   : > { %1505 = vmatpush1.bf16.msra.mxu0 %v1504_v58  ;;  %v1534_v58 = vpack.c.bf16 %v353_v57, %v349_v56  ;;  %v372_v56 = vld [vmem:[#allocation5 + $0x500] sm:$0xff] }
  0x7f   : > { %1507 = vmatprep.subr.bf16.mxu0 %v1506_v59  ;;  %v348_v59 = vld [vmem:[#allocation5 + $0x200] sm:$0xff] }
  0x80   : > { %1535 = vmatprep.subr.bf16.mxu1 %v1534_v58  ;;  %v376_v57 = vld [vmem:[#allocation5 + $0x580] sm:$0xff] }
  0x81   : > { %v1548_v58 = vpack.c.bf16 %v376_v57, %v372_v56  ;;  %v1590_v56 = vpack.c.bf16 %v599_v54, %v595_v53  ;;  %v598_v57 = vld [vmem:[#allocation5 + $0xa0] sm:$0xff]  ;;  %v343_v54 = vld [vmem:[#allocation5 + $0x118] sm:$0xff] }
  0x82   : > { %1509 = vmatpush1.bf16.msra.mxu0 %v1508_v60  ;;  %v352_v60 = vld [vmem:[#allocation5 + $0x280] sm:$0xff] }
  0x83   : > { %1511 = vmatprep.subr.bf16.mxu0 %v1510_v61  ;;  %v1536_v61 = vpack.c.bf16 %v352_v60, %v348_v59  ;;  %v381_v59 = vld [vmem:[#allocation5 + $0x608] sm:$0xff] }
  0x84   : > { %v385_v60 = vld [vmem:[#allocation5 + $0x688] sm:$0xff] }
  0x85   : > { %1537 = vmatpush1.bf16.msra.mxu1 %v1536_v61  ;;  %v1550_v61 = vpack.c.bf16 %v385_v60, %v381_v59 }
  0x86   : > { %1513 = vmatpush1.bf16.msra.mxu0 %v1512_v62  ;;  %v357_v62 = vld [vmem:[#allocation5 + $0x308] sm:$0xff] }
  0x87   : > { %1515 = vmatprep.subr.bf16.mxu0 %v1514_v63  ;;  %v361_v63 = vld [vmem:[#allocation5 + $0x388] sm:$0xff] }
  0x8a   : > { %1517 = vmatpush1.bf16.msra.mxu0 %v1516_v42  ;;  %v1538_v42 = vpack.c.bf16 %v361_v63, %v357_v62  ;;  %v380_v62 = vld [vmem:[#allocation5 + $0x600] sm:$0xff] }
  0x8b   : > { %1519 = vmatprep.subr.bf16.mxu0 %v1518_v43  ;;  %v356_v43 = vld [vmem:[#allocation5 + $0x300] sm:$0xff] }
  0x8c   : > { %1539 = vmatprep.subr.bf16.mxu1 %v1538_v42  ;;  %v384_v63 = vld [vmem:[#allocation5 + $0x680] sm:$0xff] }
  0x8d   : > { %216 = vmatmul.mubr.f32.vlgmr.msra.gmra.mrb[0].mxu0 %v2085_v40  ;;  %v1552_v42 = vpack.c.bf16 %v384_v63, %v380_v62 }
  0x8e   : > { %1521 = vmatpush1.bf16.msra.mxu0 %v1520_v44  ;;  %221 = vmatprep.mubr.f32.mxu0 %v2481_v51  ;;  %v360_v44 = vld [vmem:[#allocation5 + $0x380] sm:$0xff] }
  0x8f   : > { %1523 = vmatprep.subr.bf16.mxu0 %v1522_v45  ;;  %v1540_v45 = vpack.c.bf16 %v360_v44, %v356_v43  ;;  %v389_v43 = vld [vmem:[#allocation5 + $0x708] sm:$0xff] }
  0x90   : > { %v393_v44 = vld [vmem:[#allocation5 + $0x788] sm:$0xff] }
  0x91   : > { %222 = vmatmul.mubr.f32.gmra.mrb[2].mxu0 %v2081_v41  ;;  %1541 = vmatpush1.bf16.msra.mxu1 %v1540_v45  ;;  %v1554_v45 = vpack.c.bf16 %v393_v44, %v389_v43 }
  0x92   : > { %1525 = vmatpush1.bf16.msra.mxu0 %v1524_v46  ;;  %299 = vmatprep.mubr.f32.mxu0 %v2481_v51  ;;  %v365_v46 = vld [vmem:[#allocation5 + $0x408] sm:$0xff] }
  0x93   : > { %1591 = vmatprep.subr.bf16.mxu0 %v1590_v56 }
  0x95   : > { %1459 = vmatmul.mubr.msk.f32.vlgmr.msra.gmra.mrb[0].mxu0 %vm228_vm0, %v149_v47  ;;  %v369_v47 = vld [vmem:[#allocation5 + $0x488] sm:$0xff] }
  0x96   : > { %305 = vmatprep.mubr.f32.mxu0 %v2481_v51 }
  0x99   : > { %1460 = vmatmul.mubr.msk.f32.gmra.mrb[2].mxu0 %vm228_vm0, %v150_v48  ;;  %v1542_v48 = vpack.c.bf16 %v369_v47, %v365_v46  ;;  %v388_v46 = vld [vmem:[#allocation5 + $0x700] sm:$0xff] }
  0x9a   : > { %722 = vmatprep.mubr.f32.mxu0 %v2481_v51  ;;  %v392_v47 = vld [vmem:[#allocation5 + $0x780] sm:$0xff] }
  0x9b   : > { %1543 = vmatprep.subr.bf16.mxu1 %v1542_v48  ;;  %v1556_v48 = vpack.c.bf16 %v392_v47, %v388_v46 }
  0x9c   : > { %1545 = vmatpush1.bf16.msra.mxu1 %v1544_v52  ;;  %v1558_v52 = vpack.c.bf16 %v339_v50, %v335_v49  ;;  %v334_v50 = vld [vmem:[#allocation5 + $0x10] sm:$0xff] }
  0x9d   : > { %1547 = vmatprep.subr.bf16.mxu1 %v1546_v55  ;;  %v594_v55 = vld [vmem:[#allocation5 + $0x20] sm:$0xff] }
  0xa0   : > { %1549 = vmatpush1.bf16.msra.mxu1 %v1548_v58  ;;  %v1592_v58 = vpack.c.bf16 %v598_v57, %v594_v55  ;;  %v347_v55 = vld [vmem:[#allocation5 + $0x198] sm:$0xff] }
  0xa1   : > { %1551 = vmatprep.subr.bf16.mxu1 %v1550_v61 }
  0xa2   : > { %1593 = vmatpush1.bf16.msra.mxu0 %v1592_v58 }
  0xa4   : > { %1553 = vmatpush1.bf16.msra.mxu1 %v1552_v42 }
  0xa5   : > { %1555 = vmatprep.subr.bf16.mxu1 %v1554_v45 }
  0xa8   : > { %1557 = vmatpush1.bf16.msra.mxu1 %v1556_v48 }
  0xa9   : > { %1559 = vmatprep.subr.bf16.mxu1 %v1558_v52  ;;  %v338_v52 = vld [vmem:[#allocation5 + $0x90] sm:$0xff] }
  0xaa   : > { %v1560_v57 = vpack.c.bf16 %v338_v52, %v334_v50  ;;  %v363_v50 = vld [vmem:[#allocation5 + $0x398] sm:$0xff] }
 0x168   : > { %v301_v59 = vpop.f32.mrb[0].mxu0 }
 0x169   : > { %v1461_v60 = vmul.f32 -1.442695, %v301_v59  ;;  %v303_v61 = vpop.f32.mrb[1].mxu0 }
 0x16b   : > { %1819 = vpow2.f32 %v1461_v60  ;;  %v1562_v60 = vpack.c.bf16 %v347_v55, %v343_v54  ;;  %v358_v54 = vld [vmem:[#allocation5 + $0x310] sm:$0xff] }
 0x16c   : > { %v307_v62 = vpop.f32.mrb[2].mxu0  ;;  %v362_v55 = vld [vmem:[#allocation5 + $0x390] sm:$0xff] }
 0x16d   : > { %v1462_v63 = vmul.f32 -1.442695, %v307_v62  ;;  %v309_v42 = vpop.f32.mrb[3].mxu0  ;;  %v346_v62 = vld [vmem:[#allocation5 + $0x190] sm:$0xff] }
 0x16f   : > { %1821 = vpow2.f32 %v1462_v63 }
 0x170   : > { %1823 = vtanh.f32 %v303_v61  ;;  %v342_v61 = vld [vmem:[#allocation5 + $0x110] sm:$0xff] }
 0x171   : > { %1825 = vtanh.f32 %v309_v42  ;;  %v351_v42 = vld [vmem:[#allocation5 + $0x218] sm:$0xff] }
 0x175   : > { %v1820_v43 = vpop.eup %1819 }
 0x176   : > { %v318_v44 = vadd.f32 1.0, %v1820_v43  ;;  %v355_v43 = vld [vmem:[#allocation5 + $0x298] sm:$0xff] }
 0x178   : > { %1827 = vrcp.f32 %v318_v44 }
 0x179   : > { %v1822_v45 = vpop.eup %1821 }
 0x17a   : > { %v319_v46 = vadd.f32 1.0, %v1822_v45  ;;  %v1824_v47 = vpop.eup %1823  ;;  %v1564_v45 = vpack.c.bf16 %v346_v62, %v342_v61  ;;  %v370_v61 = vld [vmem:[#allocation5 + $0x490] sm:$0xff]  ;;  %v375_v62 = vld [vmem:[#allocation5 + $0x518] sm:$0xff] }
 0x17b   : > { %v1826_v48 = vpop.eup %1825  ;;  %v326_v49 = vsub.f32 %v1824_v47, %v2085_v40  ;;  %v350_v47 = vld [vmem:[#allocation5 + $0x210] sm:$0xff] }
 0x17c   : > { %1829 = vrcp.f32 %v319_v46  ;;  %v327_v59 = vsub.f32 %v1826_v48, %v2081_v41  ;;  %v354_v48 = vld [vmem:[#allocation5 + $0x290] sm:$0xff] }
 0x17d   : > { %v1568_v52 = vpack.c.bf16 %v354_v48, %v350_v47  ;;  %v387_v47 = vld [vmem:[#allocation5 + $0x698] sm:$0xff] }
 0x182   : > { %v1828_v53 = vpop.eup %1827 }
 0x183   : > { %v328_v56 = vmul.f32 %v1828_v53, %v326_v49  ;;  %v359_v49 = vld [vmem:[#allocation5 + $0x318] sm:$0xff] }
 0x184   : > { %v1570_v53 = vpack.c.bf16 %v363_v50, %v359_v49  ;;  %v382_v50 = vld [vmem:[#allocation5 + $0x610] sm:$0xff] }
 0x185   : > { %v2344_v58 = vadd.f32 %v2085_v40, %v328_v56  ;;  %v1566_v40 = vpack.c.bf16 %v355_v43, %v351_v42  ;;  %v367_v56 = vld [vmem:[#allocation5 + $0x418] sm:$0xff] }
 0x186   : > { %v1830_v63 = vpop.eup %1829 }
 0x187   : > { %v329_v44 = vmul.f32 %v1830_v63, %v327_v59  ;;  %461 = vmatmul.mubr.f32.vlgmr.msra.gmra.mrb[0].mxu1 %v2344_v58  ;;  %v379_v63 = vld [vmem:[#allocation5 + $0x598] sm:$0xff] }
 0x188   : > { %1561 = vmatpush1.bf16.msra.mxu1 %v1560_v57  ;;  %466 = vmatprep.mubr.f32.mxu1 %v2481_v51  ;;  %v371_v57 = vld [vmem:[#allocation5 + $0x498] sm:$0xff]  ;;  %v1578_v43 = vpack.c.bf16 %v379_v63, %v375_v62  ;;  %v596_v63 = vld [vmem:[#allocation5 + $0x30] sm:$0xff] }
 0x189   : > { %v2350_v46 = vadd.f32 %v2081_v41, %v329_v44  ;;  %1563 = vmatprep.subr.bf16.mxu1 %v1562_v60  ;;  %v1572_v41 = vpack.c.bf16 %v362_v55, %v358_v54  ;;  %v1574_v59 = vpack.c.bf16 %v371_v57, %v367_v56  ;;  %v366_v60 = vld [vmem:[#allocation5 + $0x410] sm:$0xff]  ;;  %v395_v54 = vld [vmem:[#allocation5 + $0x798] sm:$0xff] }
 0x18a   : > { %v1576_v42 = vpack.c.bf16 %v370_v61, %v366_v60  ;;  %v374_v44 = vld [vmem:[#allocation5 + $0x510] sm:$0xff]  ;;  %v601_v60 = vld [vmem:[#allocation5 + $0xb8] sm:$0xff] }
 0x18b   : > { %467 = vmatmul.mubr.f32.gmra.mrb[2].mxu1 %v2350_v46  ;;  %v390_v57 = vld [vmem:[#allocation5 + $0x710] sm:$0xff] }
 0x18c   : > { %1565 = vmatpush1.bf16.msra.mxu1 %v1564_v45  ;;  %537 = vmatprep.mubr.f32.mxu1 %v2481_v51  ;;  %v378_v45 = vld [vmem:[#allocation5 + $0x590] sm:$0xff] }
 0x18d   : > { %1567 = vmatprep.subr.bf16.mxu1 %v1566_v40  ;;  %v383_v40 = vld [vmem:[#allocation5 + $0x618] sm:$0xff]  ;;  %v1580_v48 = vpack.c.bf16 %v378_v45, %v374_v44  ;;  %v603_v44 = vld [vmem:[#allocation5 + $0x128] sm:$0xff] }
 0x18e   : > { %v1582_v49 = vpack.c.bf16 %v387_v47, %v383_v40  ;;  %v607_v45 = vld [vmem:[#allocation5 + $0x1a8] sm:$0xff]  ;;  %v602_v47 = vld [vmem:[#allocation5 + $0x120] sm:$0xff] }
 0x18f   : > { %v1594_v40 = vpack.c.bf16 %v607_v45, %v603_v44  ;;  %v616_v44 = vld [vmem:[#allocation5 + $0x2b0] sm:$0xff] }
 0x190   : > { %1569 = vmatpush1.bf16.msra.mxu1 %v1568_v52  ;;  %v386_v52 = vld [vmem:[#allocation5 + $0x690] sm:$0xff] }
 0x191   : > { %1571 = vmatprep.subr.bf16.mxu1 %v1570_v53  ;;  %v391_v53 = vld [vmem:[#allocation5 + $0x718] sm:$0xff]  ;;  %v1584_v55 = vpack.c.bf16 %v386_v52, %v382_v50  ;;  %1595 = vmatprep.subr.bf16.mxu0 %v1594_v40  ;;  %v619_v40 = vld [vmem:[#allocation5 + $0x328] sm:$0xff] }
 0x192   : > { %v1586_v56 = vpack.c.bf16 %v395_v54, %v391_v53  ;;  %v609_v52 = vld [vmem:[#allocation5 + $0x1b8] sm:$0xff]  ;;  %v604_v53 = vld [vmem:[#allocation5 + $0x130] sm:$0xff] }
 0x193   : > { %v608_v54 = vld [vmem:[#allocation5 + $0x1b0] sm:$0xff] }
 0x194   : > { %1573 = vmatpush1.bf16.msra.mxu1 %v1572_v41  ;;  %v394_v41 = vld [vmem:[#allocation5 + $0x790] sm:$0xff] }
 0x195   : > { %1575 = vmatprep.subr.bf16.mxu1 %v1574_v59  ;;  %v597_v59 = vld [vmem:[#allocation5 + $0x38] sm:$0xff]  ;;  %v1588_v61 = vpack.c.bf16 %v394_v41, %v390_v57  ;;  %v611_v57 = vld [vmem:[#allocation5 + $0x228] sm:$0xff] }
 0x196   : > { %v1622_v62 = vpack.c.bf16 %v601_v60, %v597_v59  ;;  %v615_v41 = vld [vmem:[#allocation5 + $0x2a8] sm:$0xff]  ;;  %v610_v60 = vld [vmem:[#allocation5 + $0x220] sm:$0xff] }
 0x197   : > { %v1598_v59 = vpack.c.bf16 %v615_v41, %v611_v57  ;;  %v620_v57 = vld [vmem:[#allocation5 + $0x330] sm:$0xff] }
 0x198   : > { %1577 = vmatpush1.bf16.msra.mxu1 %v1576_v42  ;;  %v600_v42 = vld [vmem:[#allocation5 + $0xb0] sm:$0xff] }
 0x199   : > { %1579 = vmatprep.subr.bf16.mxu1 %v1578_v43  ;;  %v1624_v43 = vpack.c.bf16 %v600_v42, %v596_v63  ;;  %v617_v42 = vld [vmem:[#allocation5 + $0x2b8] sm:$0xff] }
 0x19c   : > { %1581 = vmatpush1.bf16.msra.mxu1 %v1580_v48  ;;  %v606_v48 = vld [vmem:[#allocation5 + $0x1a0] sm:$0xff] }
 0x19d   : > { %1583 = vmatprep.subr.bf16.mxu1 %v1582_v49  ;;  %v605_v49 = vld [vmem:[#allocation5 + $0x138] sm:$0xff]  ;;  %v1596_v50 = vpack.c.bf16 %v606_v48, %v602_v47  ;;  %v623_v48 = vld [vmem:[#allocation5 + $0x3a8] sm:$0xff] }
 0x19f   : > { %1597 = vmatpush1.bf16.msra.mxu0 %v1596_v50  ;;  %v618_v50 = vld [vmem:[#allocation5 + $0x320] sm:$0xff] }
 0x1a0   : > { %1585 = vmatpush1.bf16.msra.mxu1 %v1584_v55  ;;  %v1626_v55 = vpack.c.bf16 %v609_v52, %v605_v49  ;;  %1599 = vmatprep.subr.bf16.mxu0 %v1598_v59  ;;  %v1602_v49 = vpack.c.bf16 %v623_v48, %v619_v40  ;;  %v622_v52 = vld [vmem:[#allocation5 + $0x3a0] sm:$0xff]  ;;  %v627_v59 = vld [vmem:[#allocation5 + $0x428] sm:$0xff]  ;;  %v628_v40 = vld [vmem:[#allocation5 + $0x430] sm:$0xff] }
 0x1a1   : > { %1587 = vmatprep.subr.bf16.mxu1 %v1586_v56  ;;  %v1628_v56 = vpack.c.bf16 %v608_v54, %v604_v53  ;;  %v621_v53 = vld [vmem:[#allocation5 + $0x338] sm:$0xff]  ;;  %v1604_v54 = vpack.c.bf16 %v622_v52, %v618_v50  ;;  %v639_v52 = vld [vmem:[#allocation5 + $0x5a8] sm:$0xff] }
 0x1a4   : > { %1589 = vmatpush1.bf16.msra.mxu1 %v1588_v61  ;;  %v614_v61 = vld [vmem:[#allocation5 + $0x2a0] sm:$0xff] }
 0x1a5   : > { %1623 = vmatprep.subr.bf16.mxu1 %v1622_v62  ;;  %v613_v62 = vld [vmem:[#allocation5 + $0x238] sm:$0xff]  ;;  %v1600_v63 = vpack.c.bf16 %v614_v61, %v610_v60  ;;  %v631_v61 = vld [vmem:[#allocation5 + $0x4a8] sm:$0xff] }
 0x1a6   : > { %v1630_v45 = vpack.c.bf16 %v617_v42, %v613_v62  ;;  %v1606_v62 = vpack.c.bf16 %v631_v61, %v627_v59  ;;  %v630_v42 = vld [vmem:[#allocation5 + $0x4a0] sm:$0xff]  ;;  %v636_v59 = vld [vmem:[#allocation5 + $0x530] sm:$0xff] }
 0x1a7   : > { %538 = vmatmul.mubr.f32.vlgmr.msra.gmra.mrb[4].mxu1 %v2344_v58  ;;  %1601 = vmatpush1.bf16.msra.mxu0 %v1600_v63  ;;  %v626_v63 = vld [vmem:[#allocation5 + $0x420] sm:$0xff] }
 0x1a8   : > { %543 = vmatprep.mubr.f32.mxu1 %v2481_v51  ;;  %1625 = vmatpush1.bf16.msra.mxu1 %v1624_v43  ;;  %v612_v43 = vld [vmem:[#allocation5 + $0x230] sm:$0xff] }
 0x1a9   : > { %1627 = vmatprep.subr.bf16.mxu1 %v1626_v55  ;;  %v1632_v47 = vpack.c.bf16 %v616_v44, %v612_v43  ;;  %v625_v55 = vld [vmem:[#allocation5 + $0x3b8] sm:$0xff]  ;;  %1603 = vmatprep.subr.bf16.mxu0 %v1602_v49  ;;  %v1608_v44 = vpack.c.bf16 %v630_v42, %v626_v63  ;;  %v635_v49 = vld [vmem:[#allocation5 + $0x528] sm:$0xff] }
 0x1aa   : > { %v1634_v41 = vpack.c.bf16 %v625_v55, %v621_v53  ;;  %v629_v43 = vld [vmem:[#allocation5 + $0x438] sm:$0xff]  ;;  %v1610_v53 = vpack.c.bf16 %v639_v52, %v635_v49  ;;  %v638_v55 = vld [vmem:[#allocation5 + $0x5a0] sm:$0xff]  ;;  %v647_v42 = vld [vmem:[#allocation5 + $0x6a8] sm:$0xff] }
 0x1ab   : > { %544 = vmatmul.mubr.f32.gmra.mrb[6].mxu1 %v2350_v46  ;;  %1605 = vmatpush1.bf16.msra.mxu0 %v1604_v54  ;;  %v634_v54 = vld [vmem:[#allocation5 + $0x520] sm:$0xff]  ;;  %v644_v49 = vld [vmem:[#allocation5 + $0x630] sm:$0xff] }
 0x1ac   : > { %799 = vmatprep.mubr.f32.mxu1 %v2481_v51  ;;  %1629 = vmatpush1.bf16.msra.mxu1 %v1628_v56  ;;  %v624_v56 = vld [vmem:[#allocation5 + $0x3b0] sm:$0xff] }
 0x1ad   : > { %1631 = vmatprep.subr.bf16.mxu1 %v1630_v45  ;;  %v1636_v60 = vpack.c.bf16 %v624_v56, %v620_v57  ;;  %v633_v45 = vld [vmem:[#allocation5 + $0x4b8] sm:$0xff]  ;;  %1607 = vmatprep.subr.bf16.mxu0 %v1606_v62  ;;  %v1612_v56 = vpack.c.bf16 %v638_v55, %v634_v54  ;;  %v643_v62 = vld [vmem:[#allocation5 + $0x628] sm:$0xff] }
 0x1ae   : > { %v1638_v48 = vpack.c.bf16 %v633_v45, %v629_v43  ;;  %v637_v57 = vld [vmem:[#allocation5 + $0x538] sm:$0xff]  ;;  %v1614_v43 = vpack.c.bf16 %v647_v42, %v643_v62  ;;  %v646_v45 = vld [vmem:[#allocation5 + $0x6a0] sm:$0xff]  ;;  %v655_v55 = vld [vmem:[#allocation5 + $0x7a8] sm:$0xff] }
 0x1af   : > { %1609 = vmatpush1.bf16.msra.mxu0 %v1608_v44  ;;  %v642_v44 = vld [vmem:[#allocation5 + $0x620] sm:$0xff]  ;;  %v652_v62 = vld [vmem:[#allocation5 + $0x730] sm:$0xff] }
 0x1b0   : > { %1633 = vmatpush1.bf16.msra.mxu1 %v1632_v47  ;;  %v632_v47 = vld [vmem:[#allocation5 + $0x4b0] sm:$0xff]  ;;  %1611 = vmatprep.subr.bf16.mxu0 %v1610_v53  ;;  %v651_v53 = vld [vmem:[#allocation5 + $0x728] sm:$0xff] }
 0x1b1   : > { %1635 = vmatprep.subr.bf16.mxu1 %v1634_v41  ;;  %v1640_v50 = vpack.c.bf16 %v632_v47, %v628_v40  ;;  %v641_v41 = vld [vmem:[#allocation5 + $0x5b8] sm:$0xff]  ;;  %v1616_v47 = vpack.c.bf16 %v646_v45, %v642_v44  ;;  %v869_v45 = vld [vmem:[#allocation5 + $0xc8] sm:$0xff] }
 0x1b2   : > { %v1642_v61 = vpack.c.bf16 %v641_v41, %v637_v57  ;;  %v645_v40 = vld [vmem:[#allocation5 + $0x638] sm:$0xff]  ;;  %v1618_v57 = vpack.c.bf16 %v655_v55, %v651_v53  ;;  %v654_v41 = vld [vmem:[#allocation5 + $0x7a0] sm:$0xff] }
 0x1b3   : > { %1613 = vmatpush1.bf16.msra.mxu0 %v1612_v56  ;;  %v650_v56 = vld [vmem:[#allocation5 + $0x720] sm:$0xff] }
 0x1b4   : > { %1637 = vmatpush1.bf16.msra.mxu1 %v1636_v60  ;;  %v640_v60 = vld [vmem:[#allocation5 + $0x5b0] sm:$0xff]  ;;  %1615 = vmatprep.subr.bf16.mxu0 %v1614_v43  ;;  %v867_v43 = vld [vmem:[#allocation5 + $0x48] sm:$0xff] }
 0x1b5   : > { %1639 = vmatprep.subr.bf16.mxu1 %v1638_v48  ;;  %v1644_v63 = vpack.c.bf16 %v640_v60, %v636_v59  ;;  %v649_v48 = vld [vmem:[#allocation5 + $0x6b8] sm:$0xff]  ;;  %v1620_v60 = vpack.c.bf16 %v654_v41, %v650_v56 }
 0x1b6   : > { %v1646_v52 = vpack.c.bf16 %v649_v48, %v645_v40  ;;  %v653_v59 = vld [vmem:[#allocation5 + $0x738] sm:$0xff]  ;;  %v1654_v40 = vpack.c.bf16 %v869_v45, %v867_v43 }
 0x1b7   : > { %1617 = vmatpush1.bf16.msra.mxu0 %v1616_v47 }
 0x1b8   : > { %1641 = vmatpush1.bf16.msra.mxu1 %v1640_v50  ;;  %v648_v50 = vld [vmem:[#allocation5 + $0x6b0] sm:$0xff]  ;;  %1619 = vmatprep.subr.bf16.mxu0 %v1618_v57 }
 0x1b9   : > { %1643 = vmatprep.subr.bf16.mxu1 %v1642_v61  ;;  %v1648_v54 = vpack.c.bf16 %v648_v50, %v644_v49  ;;  %v657_v61 = vld [vmem:[#allocation5 + $0x7b8] sm:$0xff] }
 0x1ba   : > { %v1650_v42 = vpack.c.bf16 %v657_v61, %v653_v59  ;;  %v866_v61 = vld [vmem:[#allocation5 + $0x40] sm:$0xff] }
 0x1bb   : > { %1621 = vmatpush1.bf16.msra.mxu0 %v1620_v60 }
 0x1bc   : > { %1645 = vmatpush1.bf16.msra.mxu1 %v1644_v63  ;;  %v656_v63 = vld [vmem:[#allocation5 + $0x7b0] sm:$0xff]  ;;  %1655 = vmatprep.subr.bf16.mxu0 %v1654_v40 }
 0x1bd   : > { %1647 = vmatprep.subr.bf16.mxu1 %v1646_v52  ;;  %v1652_v44 = vpack.c.bf16 %v656_v63, %v652_v62  ;;  %v868_v62 = vld [vmem:[#allocation5 + $0xc0] sm:$0xff] }
 0x1be   : > { %v1656_v45 = vpack.c.bf16 %v868_v62, %v866_v61  ;;  %v874_v62 = vld [vmem:[#allocation5 + $0x240] sm:$0xff] }
 0x1c0   : > { %1649 = vmatpush1.bf16.msra.mxu1 %v1648_v54 }
 0x1c1   : > { %1651 = vmatprep.subr.bf16.mxu1 %v1650_v42  ;;  %v871_v42 = vld [vmem:[#allocation5 + $0x148] sm:$0xff] }
 0x1c4   : > { %1653 = vmatpush1.bf16.msra.mxu1 %v1652_v44  ;;  %v873_v44 = vld [vmem:[#allocation5 + $0x1c8] sm:$0xff] }
 0x25a   : > { %v462_v47 = vpop.f32.mrb[0].mxu1 }
 0x25b   : > { %v1463_v48 = vmul.f32 -1.442695, %v462_v47  ;;  %v464_v49 = vpop.f32.mrb[1].mxu1 }
 0x25d   : > { %1831 = vpow2.f32 %v1463_v48  ;;  %v1658_v48 = vpack.c.bf16 %v873_v44, %v871_v42  ;;  %v879_v42 = vld [vmem:[#allocation5 + $0x348] sm:$0xff] }
 0x25e   : > { %v468_v50 = vpop.f32.mrb[2].mxu1  ;;  %v881_v44 = vld [vmem:[#allocation5 + $0x3c8] sm:$0xff] }
 0x25f   : > { %v1464_v52 = vmul.f32 -1.442695, %v468_v50  ;;  %v470_v54 = vpop.f32.mrb[3].mxu1  ;;  %v872_v50 = vld [vmem:[#allocation5 + $0x1c0] sm:$0xff] }
 0x261   : > { %1833 = vpow2.f32 %v1464_v52 }
 0x262   : > { %1835 = vtanh.f32 %v464_v49  ;;  %v870_v49 = vld [vmem:[#allocation5 + $0x140] sm:$0xff] }
 0x263   : > { %1837 = vtanh.f32 %v470_v54  ;;  %v875_v54 = vld [vmem:[#allocation5 + $0x248] sm:$0xff] }
 0x267   : > { %v1832_v53 = vpop.eup %1831 }
 0x268   : > { %v556_v55 = vadd.f32 1.0, %v1832_v53  ;;  %v877_v53 = vld [vmem:[#allocation5 + $0x2c8] sm:$0xff] }
 0x269   : > { %v1662_v61 = vpack.c.bf16 %v877_v53, %v875_v54  ;;  %v883_v54 = vld [vmem:[#allocation5 + $0x448] sm:$0xff] }
 0x26a   : > { %1839 = vrcp.f32 %v556_v55  ;;  %v885_v53 = vld [vmem:[#allocation5 + $0x4c8] sm:$0xff] }
 0x26b   : > { %v1834_v57 = vpop.eup %1833 }
 0x26c   : > { %v557_v56 = vadd.f32 1.0, %v1834_v57  ;;  %v1836_v41 = vpop.eup %1835 }
 0x26d   : > { %v1838_v59 = vpop.eup %1837  ;;  %v564_v60 = vsub.f32 %v1836_v41, %v2344_v58 }
 0x26e   : > { %1841 = vrcp.f32 %v557_v56  ;;  %v565_v47 = vsub.f32 %v1838_v59, %v2350_v46  ;;  %v1660_v56 = vpack.c.bf16 %v872_v50, %v870_v49  ;;  %v1666_v50 = vpack.c.bf16 %v881_v44, %v879_v42  ;;  %v886_v42 = vld [vmem:[#allocation5 + $0x540] sm:$0xff] }
 0x26f   : > { %v888_v44 = vld [vmem:[#allocation5 + $0x5c0] sm:$0xff] }
 0x274   : > { %v1840_v63 = vpop.eup %1839 }
 0x275   : > { %v566_v43 = vmul.f32 %v1840_v63, %v564_v60  ;;  %v876_v63 = vld [vmem:[#allocation5 + $0x2c0] sm:$0xff] }
 0x277   : > { %v2360_v40 = vadd.f32 %v566_v43, %v2344_v58 }
 0x278   : > { %v1842_v52 = vpop.eup %1841 }
 0x279   : > { %v567_v55 = vmul.f32 %v1842_v52, %v565_v47  ;;  %723 = vmatmul.mubr.f32.vlgmr.msra.gmra.mrb[4].mxu0 %v2360_v40  ;;  %800 = vmatmul.mubr.f32.vlgmr.msra.gmra.mrb[8].mxu1 %v2360_v40  ;;  %v880_v52 = vld [vmem:[#allocation5 + $0x3c0] sm:$0xff] }
 0x27a   : > { %v539_v57 = vpop.f32.mrb[4].mxu1  ;;  %1657 = vmatpush1.bf16.msra.mxu0 %v1656_v45  ;;  %728 = vmatprep.mubr.f32.mxu0 %v2481_v51  ;;  %v1664_v45 = vpack.c.bf16 %v876_v63, %v874_v62  ;;  %v887_v62 = vld [vmem:[#allocation5 + $0x548] sm:$0xff] }
 0x27b   : > { %v2367_v41 = vadd.f32 %v567_v55, %v2350_v46  ;;  %v1465_v59 = vmul.f32 -1.442695, %v539_v57  ;;  %v2369_v60 = vpop.f32.mrb[5].mxu1  ;;  %805 = vmatprep.mubr.f32.mxu1 %v2481_v51  ;;  %1659 = vmatprep.subr.bf16.mxu0 %v1658_v48  ;;  %v878_v48 = vld [vmem:[#allocation5 + $0x340] sm:$0xff]  ;;  %v1670_v57 = vpack.c.bf16 %v885_v53, %v883_v54  ;;  %v889_v63 = vld [vmem:[#allocation5 + $0x5c8] sm:$0xff] }
 0x27c   : > { %v1668_v55 = vpack.c.bf16 %v880_v52, %v878_v48  ;;  %v890_v48 = vld [vmem:[#allocation5 + $0x640] sm:$0xff]  ;;  %v895_v53 = vld [vmem:[#allocation5 + $0x748] sm:$0xff] }
 0x27d   : > { %1843 = vpow2.f32 %v1465_v59  ;;  %729 = vmatmul.mubr.f32.gmra.mrb[6].mxu0 %v2367_v41  ;;  %806 = vmatmul.mubr.f32.gmra.mrb[10].mxu1 %v2367_v41  ;;  %v882_v59 = vld [vmem:[#allocation5 + $0x440] sm:$0xff] }
 0x27e   : > { %v545_v43 = vpop.f32.mrb[6].mxu1  ;;  %1661 = vmatpush1.bf16.msra.mxu0 %v1660_v56  ;;  %962 = vmatprep.mubr.f32.mxu0 %v2481_v51  ;;  %v884_v56 = vld [vmem:[#allocation5 + $0x4c0] sm:$0xff] }
 0x27f   : > { %v1466_v47 = vmul.f32 -1.442695, %v545_v43  ;;  %v547_v49 = vpop.f32.mrb[7].mxu1  ;;  %1663 = vmatprep.subr.bf16.mxu0 %v1662_v61  ;;  %1091 = vmatprep.mubr.f32.mxu1 %v2481_v51  ;;  %v1672_v43 = vpack.c.bf16 %v884_v56, %v882_v59  ;;  %v1674_v61 = vpack.c.bf16 %v889_v63, %v887_v62  ;;  %v891_v51 = vld [vmem:[#allocation5 + $0x648] sm:$0xff]  ;;  %v892_v52 = vld [vmem:[#allocation5 + $0x6c0] sm:$0xff]  ;;  %v584_v59 = vmax.f32 %v2369_v60, 0.0 }
 0x280   : > { %v894_v56 = vld [vmem:[#allocation5 + $0x740] sm:$0xff]  ;;  %v1129_v63 = vld [vmem:[#allocation5 + $0xe8] sm:$0xff] }
 0x281   : > { %1845 = vpow2.f32 %v1466_v47  ;;  %v896_v62 = vld [vmem:[#allocation5 + $0x7c0] sm:$0xff] }
 0x282   : > { %1665 = vmatpush1.bf16.msra.mxu0 %v1664_v45  ;;  %v1676_v45 = vpack.c.bf16 %v888_v44, %v886_v42 }
 0x283   : > { %1667 = vmatprep.subr.bf16.mxu0 %v1666_v50  ;;  %v1678_v50 = vpack.c.bf16 %v893_v2, %v891_v51  ;;  %v586_v2 = vsub.f32 %v584_v59, %v2344_v58  ;;  %v585_v51 = vmax.f32 %v547_v49, 0.0  ;;  %v1126_v49 = vld [vmem:[#allocation5 + $0x60] sm:$0xff]  ;;  %v995_v59 = vld [vmem:[#allocation5 + $0x50] sm:$0xff] }
 0x285   : > { %v587_v60 = vsub.f32 %v585_v51, %v2350_v46  ;;  %v1000_v51 = vld [vmem:[#allocation5 + $0x158] sm:$0xff] }
 0x286   : > { %1669 = vmatpush1.bf16.msra.mxu0 %v1668_v55  ;;  %v897_v55 = vld [vmem:[#allocation5 + $0x7c8] sm:$0xff] }
 0x287   : > { %v1844_v0 = vpop.eup %1843  ;;  %1671 = vmatprep.subr.bf16.mxu0 %v1670_v57  ;;  %v1680_v57 = vpack.c.bf16 %v892_v52, %v890_v48  ;;  %v2499_v48 = vmov 0.0  }
 0x288   : > { %v578_v1 = vadd.f32 1.0, %v1844_v0  ;;  %v1682_v0 = vpack.c.bf16 %v897_v55, %v895_v53  ;;  %v996_v53 = vld [vmem:[#allocation5 + $0x58] sm:$0xff] }
 0x289   : > { %v998_v55 = vld [vmem:[#allocation5 + $0xd8] sm:$0xff] }
 0x28a   : > { %1847 = vrcp.f32 %v578_v1  ;;  %1673 = vmatpush1.bf16.msra.mxu0 %v1672_v43  ;;  %v1127_v1 = vld [vmem:[#allocation5 + $0x68] sm:$0xff]  ;;  %v1684_v43 = vpack.c.bf16 %v896_v62, %v894_v56 }
 0x28b   : > { %v1846_v47 = vpop.eup %1845  ;;  %1675 = vmatprep.subr.bf16.mxu0 %v1674_v61  ;;  %v1718_v61 = vpack.c.bf16 %v1129_v63, %v1127_v1  ;;  %v1131_v62 = vld [vmem:[#allocation5 + $0x168] sm:$0xff] }
 0x28c   : > { %v579_v54 = vadd.f32 1.0, %v1846_v47  ;;  %v1133_v1 = vld [vmem:[#allocation5 + $0x1e8] sm:$0xff] }
 0x28d   : > { %v1722_v63 = vpack.c.bf16 %v1133_v1, %v1131_v62  ;;  %v1005_v62 = vld [vmem:[#allocation5 + $0x2d0] sm:$0xff] }
 0x28e   : > { %1849 = vrcp.f32 %v579_v54  ;;  %1677 = vmatpush1.bf16.msra.mxu0 %v1676_v45  ;;  %v1128_v54 = vld [vmem:[#allocation5 + $0xe0] sm:$0xff] }
 0x28f   : > { %1679 = vmatprep.subr.bf16.mxu0 %v1678_v50 }
 0x292   : > { %1681 = vmatpush1.bf16.msra.mxu0 %v1680_v57  ;;  %v1686_v57 = vpack.c.bf16 %v998_v55, %v996_v53  ;;  %v1136_v53 = vld [vmem:[#allocation5 + $0x2e0] sm:$0xff] }
 0x293   : > { %1683 = vmatprep.subr.bf16.mxu0 %v1682_v0  ;;  %v997_v0 = vld [vmem:[#allocation5 + $0xd0] sm:$0xff] }
 0x294   : > { %v1848_v42 = vpop.eup %1847  ;;  %v1688_v56 = vpack.c.bf16 %v997_v0, %v995_v59  ;;  %1687 = vmatprep.subr.bf16.mxu1 %v1686_v57  ;;  %v1004_v57 = vld [vmem:[#allocation5 + $0x258] sm:$0xff] }
 0x295   : > { %v588_v44 = vmul.f32 %v1848_v42, %v586_v2  ;;  %v1006_v59 = vld [vmem:[#allocation5 + $0x2d8] sm:$0xff] }
 0x296   : > { %1685 = vmatpush1.bf16.msra.mxu0 %v1684_v43  ;;  %v1132_v43 = vld [vmem:[#allocation5 + $0x1e0] sm:$0xff]  ;;  %1689 = vmatpush1.bf16.msra.mxu1 %v1688_v56  ;;  %v1694_v0 = vpack.c.bf16 %v1006_v59, %v1004_v57  ;;  %v1003_v56 = vld [vmem:[#allocation5 + $0x250] sm:$0xff] }
 0x297   : > { %v2379_v45 = vadd.f32 %v588_v44, %v2344_v58  ;;  %1719 = vmatprep.subr.bf16.mxu0 %v1718_v61  ;;  %v1720_v58 = vpack.c.bf16 %v1128_v54, %v1126_v49  ;;  %v1002_v61 = vld [vmem:[#allocation5 + $0x1d8] sm:$0xff]  ;;  %v999_v44 = vld [vmem:[#allocation5 + $0x150] sm:$0xff]  ;;  %v1137_v49 = vld [vmem:[#allocation5 + $0x2e8] sm:$0xff]  ;;  %v1696_v1 = vpack.c.bf16 %v1005_v62, %v1003_v56 }
 0x298   : > { %v1850_v47 = vpop.eup %1849  ;;  %v1690_v42 = vpack.c.bf16 %v1002_v61, %v1000_v51  ;;  %v1140_v51 = vld [vmem:[#allocation5 + $0x3e0] sm:$0xff]  ;;  %v1014_v56 = vld [vmem:[#allocation5 + $0x4d8] sm:$0xff] }
 0x299   : > { %v589_v50 = vmul.f32 %v1850_v47, %v587_v60  ;;  %963 = vmatmul.mubr.f32.vlgmr.msra.gmra.mrb[8].mxu0 %v2379_v45  ;;  %v1001_v60 = vld [vmem:[#allocation5 + $0x1d0] sm:$0xff]  ;;  %v1144_v57 = vld [vmem:[#allocation5 + $0x4e0] sm:$0xff] }
 0x29a   : > { %968 = vmatprep.mubr.f32.mxu0 %v2499_v48  ;;  %1721 = vmatpush1.bf16.msra.mxu0 %v1720_v58  ;;  %v1692_v47 = vpack.c.bf16 %v1001_v60, %v999_v44  ;;  %v1134_v58 = vld [vmem:[#allocation5 + $0x260] sm:$0xff]  ;;  %v1010_v44 = vld [vmem:[#allocation5 + $0x3d8] sm:$0xff] }
 0x29b   : > { %v2385_v52 = vadd.f32 %v589_v50, %v2350_v46  ;;  %v1130_v46 = vld [vmem:[#allocation5 + $0x160] sm:$0xff]  ;;  %1723 = vmatprep.subr.bf16.mxu0 %v1722_v63  ;;  %v1135_v50 = vld [vmem:[#allocation5 + $0x268] sm:$0xff]  ;;  %1691 = vmatprep.subr.bf16.mxu1 %v1690_v42  ;;  %v1728_v55 = vpack.c.bf16 %v1136_v53, %v1134_v58  ;;  %v1008_v42 = vld [vmem:[#allocation5 + $0x358] sm:$0xff] }
 0x29c   : > { %v1724_v2 = vpack.c.bf16 %v1132_v43, %v1130_v46  ;;  %v1726_v54 = vpack.c.bf16 %v1137_v49, %v1135_v50  ;;  %1693 = vmatpush1.bf16.msra.mxu1 %v1692_v47  ;;  %v1139_v63 = vld [vmem:[#allocation5 + $0x368] sm:$0xff]  ;;  %v1698_v60 = vpack.c.bf16 %v1010_v44, %v1008_v42  ;;  %v1007_v47 = vld [vmem:[#allocation5 + $0x350] sm:$0xff]  ;;  %v1148_v42 = vld [vmem:[#allocation5 + $0x5e0] sm:$0xff] }
 0x29d   : > { %969 = vmatmul.mubr.f32.gmra.mrb[10].mxu0 %v2385_v52  ;;  %v1141_v46 = vld [vmem:[#allocation5 + $0x3e8] sm:$0xff]  ;;  %1695 = vmatprep.subr.bf16.mxu1 %v1694_v0  ;;  %v1009_v50 = vld [vmem:[#allocation5 + $0x3d0] sm:$0xff]  ;;  %v1012_v0 = vld [vmem:[#allocation5 + $0x458] sm:$0xff] }
 0x29e   : > { %1222 = vmatprep.mubr.f32.mxu0 %v2499_v48  ;;  %1725 = vmatpush1.bf16.msra.mxu0 %v1724_v2  ;;  %v1730_v43 = vpack.c.bf16 %v1141_v46, %v1139_v63  ;;  %v1138_v2 = vld [vmem:[#allocation5 + $0x360] sm:$0xff]  ;;  %v1700_v49 = vpack.c.bf16 %v1009_v50, %v1007_v47  ;;  %v1145_v58 = vld [vmem:[#allocation5 + $0x4e8] sm:$0xff]  ;;  %v1702_v62 = vpack.c.bf16 %v1014_v56, %v1012_v0  ;;  %v1013_v63 = vld [vmem:[#allocation5 + $0x4d0] sm:$0xff] }
 0x29f   : > { %1727 = vmatprep.subr.bf16.mxu0 %v1726_v54  ;;  %v1732_v61 = vpack.c.bf16 %v1140_v51, %v1138_v2  ;;  %v1143_v54 = vld [vmem:[#allocation5 + $0x468] sm:$0xff]  ;;  %v1018_v47 = vld [vmem:[#allocation5 + $0x5d8] sm:$0xff]  ;;  %v1152_v0 = vld [vmem:[#allocation5 + $0x6e0] sm:$0xff] }
 0x2a0   : > { %1697 = vmatpush1.bf16.msra.mxu1 %v1696_v1  ;;  %v1734_v53 = vpack.c.bf16 %v1145_v58, %v1143_v54  ;;  %v1011_v1 = vld [vmem:[#allocation5 + $0x450] sm:$0xff]  ;;  %v1149_v2 = vld [vmem:[#allocation5 + $0x5e8] sm:$0xff] }
 0x2a1   : > { %1699 = vmatprep.subr.bf16.mxu1 %v1698_v60  ;;  %v1704_v46 = vpack.c.bf16 %v1013_v63, %v1011_v1  ;;  %v1016_v60 = vld [vmem:[#allocation5 + $0x558] sm:$0xff]  ;;  %v1017_v54 = vld [vmem:[#allocation5 + $0x5d0] sm:$0xff] }
 0x2a2   : > { %1729 = vmatpush1.bf16.msra.mxu0 %v1728_v55  ;;  %v1142_v55 = vld [vmem:[#allocation5 + $0x460] sm:$0xff]  ;;  %v1706_v50 = vpack.c.bf16 %v1018_v47, %v1016_v60  ;;  %v1022_v1 = vld [vmem:[#allocation5 + $0x6d8] sm:$0xff] }
 0x2a3   : > { %1731 = vmatprep.subr.bf16.mxu0 %v1730_v43  ;;  %v1736_v59 = vpack.c.bf16 %v1144_v57, %v1142_v55  ;;  %v1147_v43 = vld [vmem:[#allocation5 + $0x568] sm:$0xff]  ;;  %v1156_v60 = vld [vmem:[#allocation5 + $0x7e0] sm:$0xff] }
 0x2a4   : > { %1701 = vmatpush1.bf16.msra.mxu1 %v1700_v49  ;;  %v1738_v51 = vpack.c.bf16 %v1149_v2, %v1147_v43  ;;  %v1015_v49 = vld [vmem:[#allocation5 + $0x550] sm:$0xff]  ;;  %v1153_v55 = vld [vmem:[#allocation5 + $0x6e8] sm:$0xff] }
 0x2a5   : > { %1703 = vmatprep.subr.bf16.mxu1 %v1702_v62  ;;  %v1708_v58 = vpack.c.bf16 %v1017_v54, %v1015_v49  ;;  %v1020_v62 = vld [vmem:[#allocation5 + $0x658] sm:$0xff]  ;;  %v1021_v43 = vld [vmem:[#allocation5 + $0x6d0] sm:$0xff] }
 0x2a6   : > { %1733 = vmatpush1.bf16.msra.mxu0 %v1732_v61  ;;  %v1146_v61 = vld [vmem:[#allocation5 + $0x560] sm:$0xff]  ;;  %v1710_v63 = vpack.c.bf16 %v1022_v1, %v1020_v62  ;;  %v1026_v49 = vld [vmem:[#allocation5 + $0x7d8] sm:$0xff] }
 0x2a7   : > { %1735 = vmatprep.subr.bf16.mxu0 %v1734_v53  ;;  %v1740_v44 = vpack.c.bf16 %v1148_v42, %v1146_v61  ;;  %v1151_v53 = vld [vmem:[#allocation5 + $0x668] sm:$0xff] }
 0x2a8   : > { %1705 = vmatpush1.bf16.msra.mxu1 %v1704_v46  ;;  %v1742_v57 = vpack.c.bf16 %v1153_v55, %v1151_v53  ;;  %v1019_v46 = vld [vmem:[#allocation5 + $0x650] sm:$0xff]  ;;  %v1157_v61 = vld [vmem:[#allocation5 + $0x7e8] sm:$0xff] }
 0x2a9   : > { %1707 = vmatprep.subr.bf16.mxu1 %v1706_v50  ;;  %v1712_v2 = vpack.c.bf16 %v1021_v43, %v1019_v46  ;;  %v1024_v50 = vld [vmem:[#allocation5 + $0x758] sm:$0xff]  ;;  %v1025_v53 = vld [vmem:[#allocation5 + $0x7d0] sm:$0xff] }
 0x2aa   : > { %1737 = vmatpush1.bf16.msra.mxu0 %v1736_v59  ;;  %v1150_v59 = vld [vmem:[#allocation5 + $0x660] sm:$0xff]  ;;  %v1714_v54 = vpack.c.bf16 %v1026_v49, %v1024_v50 }
 0x2ab   : > { %1739 = vmatprep.subr.bf16.mxu0 %v1738_v51  ;;  %v1744_v56 = vpack.c.bf16 %v1152_v0, %v1150_v59  ;;  %v1155_v51 = vld [vmem:[#allocation5 + $0x768] sm:$0xff]  ;;  %v1270_v59 = vld [vmem:[#allocation5 + $0xf8] sm:$0xff] }
 0x2ac   : > { %1709 = vmatpush1.bf16.msra.mxu1 %v1708_v58  ;;  %v1746_v42 = vpack.c.bf16 %v1157_v61, %v1155_v51  ;;  %v1023_v58 = vld [vmem:[#allocation5 + $0x750] sm:$0xff] }
 0x2ad   : > { %1711 = vmatprep.subr.bf16.mxu1 %v1710_v63  ;;  %v1716_v55 = vpack.c.bf16 %v1025_v53, %v1023_v58 }
 0x2ae   : > { %1741 = vmatpush1.bf16.msra.mxu0 %v1740_v44  ;;  %v1154_v44 = vld [vmem:[#allocation5 + $0x760] sm:$0xff] }
 0x2af   : > { %1743 = vmatprep.subr.bf16.mxu0 %v1742_v57  ;;  %v1748_v47 = vpack.c.bf16 %v1156_v60, %v1154_v44  ;;  %v1268_v57 = vld [vmem:[#allocation5 + $0x78] sm:$0xff] }
 0x2b0   : > { %1713 = vmatpush1.bf16.msra.mxu1 %v1712_v2  ;;  %v1750_v0 = vpack.c.bf16 %v1270_v59, %v1268_v57 }
 0x2b1   : > { %1715 = vmatprep.subr.bf16.mxu1 %v1714_v54 }
 0x2b2   : > { %1745 = vmatpush1.bf16.msra.mxu0 %v1744_v56 }
 0x2b3   : > { %1747 = vmatprep.subr.bf16.mxu0 %v1746_v42 }
 0x2b4   : > { %1717 = vmatpush1.bf16.msra.mxu1 %v1716_v55 }
 0x2b5   : > { %1751 = vmatprep.subr.bf16.mxu1 %v1750_v0 }
 0x2b6   : > { %1749 = vmatpush1.bf16.msra.mxu0 %v1748_v47 }
 0x34c   : > { %v724_v56 = vpop.f32.mrb[4].mxu0  ;;  %v801_v62 = vpop.f32.mrb[8].mxu1 }
 0x34d   : > { %v1467_v1 = vmul.f32 -1.442695, %v724_v56  ;;  %v1471_v63 = vmul.f32 -1.442695, %v801_v62  ;;  %v726_v46 = vpop.f32.mrb[5].mxu0  ;;  %v803_v43 = vpop.f32.mrb[9].mxu1 }
 0x34e   : > { %v1469_v2 = vmul.f32 -1.442695, %v726_v46 }
 0x34f   : > { %1851 = vpow2.f32 %v1467_v1 }
 0x350   : > { %1853 = vpow2.f32 %v1471_v63  ;;  %v730_v51 = vpop.f32.mrb[6].mxu0  ;;  %v807_v61 = vpop.f32.mrb[10].mxu1 }
 0x351   : > { %1855 = vpow2.f32 %v1469_v2  ;;  %v1468_v42 = vmul.f32 -1.442695, %v730_v51  ;;  %v1472_v44 = vmul.f32 -1.442695, %v807_v61  ;;  %v732_v60 = vpop.f32.mrb[7].mxu0  ;;  %v809_v47 = vpop.f32.mrb[11].mxu1 }
 0x352   : > { %v1470_v50 = vmul.f32 -1.442695, %v732_v60  ;;  %v1267_v60 = vld [vmem:[#allocation5 + $0x70] sm:$0xff] }
 0x353   : > { %1857 = vpow2.f32 %v1468_v42 }
 0x354   : > { %1859 = vpow2.f32 %v1472_v44 }
 0x355   : > { %1861 = vpow2.f32 %v1470_v50 }
 0x356   : > { %1863 = vtanh.f32 %v803_v43 }
 0x357   : > { %1865 = vtanh.f32 %v809_v47  ;;  %v1269_v47 = vld [vmem:[#allocation5 + $0xf0] sm:$0xff] }
 0x359   : > { %v1852_v49 = vpop.eup %1851 }
 0x35a   : > { %v1854_v54 = vpop.eup %1853  ;;  %v818_v55 = vadd.f32 1.0, %v1852_v49 }
 0x35b   : > { %v1856_v58 = vpop.eup %1855  ;;  %v850_v53 = vadd.f32 1.0, %v1854_v54 }
 0x35c   : > { %v830_v57 = vadd.f32 1.0, %v1856_v58  ;;  %v1272_v58 = vld [vmem:[#allocation5 + $0x178] sm:$0xff] }
 0x35d   : > { %v1858_v59 = vpop.eup %1857  ;;  %1867 = vrcp.f32 %v850_v53  ;;  %v1274_v53 = vld [vmem:[#allocation5 + $0x1f8] sm:$0xff] }
 0x35e   : > { %v1860_v0 = vpop.eup %1859  ;;  %1869 = vrcp.f32 %v830_v57  ;;  %v819_v1 = vadd.f32 1.0, %v1858_v59 }
 0x35f   : > { %v1862_v56 = vpop.eup %1861  ;;  %v851_v62 = vadd.f32 1.0, %v1860_v0  ;;  %1871 = vrcp.f32 %v818_v55 }
 0x360   : > { %v831_v63 = vadd.f32 1.0, %v1862_v56  ;;  %v1864_v46 = vpop.eup %1863  ;;  %v1752_v56 = vpack.c.bf16 %v1269_v47, %v1267_v60  ;;  %v1278_v60 = vld [vmem:[#allocation5 + $0x2f8] sm:$0xff] }
 0x361   : > { %1873 = vrcp.f32 %v851_v62  ;;  %v1866_v43 = vpop.eup %1865  ;;  %v858_v2 = vsub.f32 %v1864_v46, %v2360_v40 }
 0x362   : > { %1875 = vrcp.f32 %v831_v63  ;;  %v859_v54 = vsub.f32 %v1866_v43, %v2367_v41 }
 0x363   : > { %1877 = vrcp.f32 %v819_v1 }
 0x367   : > { %v1868_v51 = vpop.eup %1867 }
 0x368   : > { %v1870_v61 = vpop.eup %1869  ;;  %v860_v42 = vmul.f32 %v1868_v51, %v858_v2  ;;  %v1754_v2 = vpack.c.bf16 %v1274_v53, %v1272_v58  ;;  %v1271_v51 = vld [vmem:[#allocation5 + $0x170] sm:$0xff] }
 0x369   : > { %v836_v44 = vsub.f32 %v1870_v61, %v2360_v40  ;;  %v1872_v50 = vpop.eup %1871  ;;  %v1273_v61 = vld [vmem:[#allocation5 + $0x1f0] sm:$0xff] }
 0x36a   : > { %v2392_v49 = vadd.f32 %v860_v42, %v2360_v40 }
 0x36b   : > { %v1874_v55 = vpop.eup %1873  ;;  %v838_v57 = vmul.f32 %v1872_v50, %v836_v44  ;;  %v1276_v50 = vld [vmem:[#allocation5 + $0x278] sm:$0xff] }
 0x36c   : > { %v1876_v59 = vpop.eup %1875  ;;  %v964_v0 = vpop.f32.mrb[8].mxu0  ;;  %1223 = vmatmul.mubr.f32.vlgmr.msra.gmra.mrb[12].mxu0 %v2392_v49  ;;  %v861_v62 = vmul.f32 %v1874_v55, %v859_v54  ;;  %v1756_v55 = vpack.c.bf16 %v1273_v61, %v1271_v51  ;;  %v1279_v51 = vld [vmem:[#allocation5 + $0x370] sm:$0xff] }
 0x36d   : > { %v1473_v1 = vmul.f32 -1.442695, %v964_v0  ;;  %v2396_v63 = vpop.f32.mrb[9].mxu0  ;;  %v2399_v46 = vadd.f32 %v838_v57, %v2360_v40  ;;  %1228 = vmatprep.mubr.f32.mxu0 %v2499_v48  ;;  %v837_v43 = vsub.f32 %v1876_v59, %v2367_v41  ;;  %v1878_v42 = vpop.eup %1877  ;;  %v1758_v59 = vpack.c.bf16 %v1278_v60, %v1276_v50  ;;  %v1275_v0 = vld [vmem:[#allocation5 + $0x270] sm:$0xff] }
 0x36e   : > { %v2404_v44 = vadd.f32 %v861_v62, %v2367_v41  ;;  %v1277_v62 = vld [vmem:[#allocation5 + $0x2f0] sm:$0xff] }
 0x36f   : > { %1879 = vpow2.f32 %v1473_v1  ;;  %1092 = vmatmul.mubr.f32.vlgmr.msra.gmra.mrb[12].mxu1 %v2399_v46  ;;  %v839_v47 = vmul.f32 %v1878_v42, %v837_v43  ;;  %v1280_v1 = vld [vmem:[#allocation5 + $0x378] sm:$0xff]  ;;  %v1281_v61 = vld [vmem:[#allocation5 + $0x3f0] sm:$0xff] }
 0x370   : > { %1753 = vmatpush1.bf16.msra.mxu1 %v1752_v56  ;;  %v970_v54 = vpop.f32.mrb[10].mxu0  ;;  %1229 = vmatmul.mubr.f32.gmra.mrb[14].mxu0 %v2404_v44  ;;  %v1760_v56 = vpack.c.bf16 %v1277_v62, %v1275_v0  ;;  %v1762_v43 = vpack.c.bf16 %v1282_v3, %v1280_v1  ;;  %v1286_v42 = vld [vmem:[#allocation5 + $0x4f8] sm:$0xff]  ;;  %v1770_v3 = vpack.c.bf16 %v1290_v6, %v1288_v5  ;;  %v1289_v62 = vld [vmem:[#allocation5 + $0x5f0] sm:$0xff] }
 0x371   : > { %v1474_v58 = vmul.f32 -1.442695, %v970_v54  ;;  %v2408_v53 = vpop.f32.mrb[11].mxu0  ;;  %1097 = vmatprep.mubr.f32.mxu1 %v2499_v48  ;;  %1755 = vmatprep.subr.bf16.mxu1 %v1754_v2  ;;  %v2412_v57 = vadd.f32 %v839_v47, %v2367_v41  ;;  %v1284_v2 = vld [vmem:[#allocation5 + $0x478] sm:$0xff]  ;;  %v1764_v47 = vpack.c.bf16 %v1281_v61, %v1279_v51  ;;  %v1283_v54 = vld [vmem:[#allocation5 + $0x470] sm:$0xff] }
 0x372   : > { %v1766_v60 = vpack.c.bf16 %v1286_v42, %v1284_v2  ;;  %v1291_v61 = vld [vmem:[#allocation5 + $0x670] sm:$0xff]  ;;  %v1296_v42 = vld [vmem:[#allocation5 + $0x778] sm:$0xff] }
 0x373   : > { %1881 = vpow2.f32 %v1474_v58  ;;  %1098 = vmatmul.mubr.f32.gmra.mrb[14].mxu1 %v2412_v57  ;;  %v1293_v2 = vld [vmem:[#allocation5 + $0x6f0] sm:$0xff] }
 0x374   : > { %1757 = vmatpush1.bf16.msra.mxu1 %v1756_v55  ;;  %1363 = vmatprep.mubr.f32.mxu1 %v2499_v48  ;;  %v1768_v55 = vpack.c.bf16 %v1285_v4, %v1283_v54  ;;  %v987_v4 = vsub.f32 %v2396_v63, %v2379_v45  ;;  %v1295_v6 = vld [vmem:[#allocation5 + $0x770] sm:$0xff] }
 0x375   : > { %1759 = vmatprep.subr.bf16.mxu1 %v1758_v59  ;;  %v1287_v59 = vld [vmem:[#allocation5 + $0x570] sm:$0xff] }
 0x378   : > { %1761 = vmatpush1.bf16.msra.mxu1 %v1760_v56  ;;  %v1294_v56 = vld [vmem:[#allocation5 + $0x6f8] sm:$0xff] }
 0x379   : > { %v1880_v50 = vpop.eup %1879  ;;  %1763 = vmatprep.subr.bf16.mxu1 %v1762_v43  ;;  %v1772_v43 = vpack.c.bf16 %v1289_v62, %v1287_v59  ;;  %v1774_v51 = vpack.c.bf16 %v1294_v56, %v1292_v7  ;;  %v988_v7 = vsub.f32 %v2408_v53, %v2385_v52 }
 0x37a   : > { %v981_v58 = vadd.f32 1.0, %v1880_v50  ;;  %v1298_v50 = vld [vmem:[#allocation5 + $0x7f8] sm:$0xff] }
 0x37b   : > { %v1778_v5 = vpack.c.bf16 %v1298_v50, %v1296_v42 }
 0x37c   : > { %1883 = vrcp.f32 %v981_v58  ;;  %1765 = vmatpush1.bf16.msra.mxu1 %v1764_v47  ;;  %v1776_v47 = vpack.c.bf16 %v1293_v2, %v1291_v61 }
 0x37d   : > { %v1882_v0 = vpop.eup %1881  ;;  %1767 = vmatprep.subr.bf16.mxu1 %v1766_v60  ;;  %v1297_v60 = vld [vmem:[#allocation5 + $0x7f0] sm:$0xff] }
 0x37e   : > { %v982_v1 = vadd.f32 1.0, %v1882_v0 }
 0x380   : > { %1885 = vrcp.f32 %v982_v1  ;;  %1769 = vmatpush1.bf16.msra.mxu1 %v1768_v55  ;;  %v1780_v55 = vpack.c.bf16 %v1297_v60, %v1295_v6 }
 0x381   : > { %1771 = vmatprep.subr.bf16.mxu1 %v1770_v3 }
 0x384   : > { %1773 = vmatpush1.bf16.msra.mxu1 %v1772_v43 }
 0x385   : > { %1775 = vmatprep.subr.bf16.mxu1 %v1774_v51 }
 0x386   : > { %v1884_v54 = vpop.eup %1883 }
 0x387   : > { %v989_v58 = vmul.f32 %v1884_v54, %v987_v4 }
 0x388   : > { %1777 = vmatpush1.bf16.msra.mxu1 %v1776_v47 }
 0x389   : > { %1779 = vmatprep.subr.bf16.mxu1 %v1778_v5  ;;  %v2421_v59 = vadd.f32 %v989_v58, %v2379_v45 }
 0x38a   : > { %v1886_v0 = vpop.eup %1885 }
 0x38b   : > { %v990_v3 = vmul.f32 %v1886_v0, %v988_v7 }
 0x38c   : > { %1781 = vmatpush1.bf16.msra.mxu1 %v1780_v55 }
 0x38d   : > { %v2426_v63 = vadd.f32 %v990_v3, %v2385_v52 }
 0x38f   : > { %1364 = vmatmul.mubr.f32.vlgmr.msra.gmra.mrb[16].mxu1 %v2421_v59 }
 0x390   : > { %1369 = vmatprep.mubr.f32.mxu1 %v2499_v48 }
 0x393   : > { %1370 = vmatmul.mubr.f32.gmra.mrb[18].mxu1 %v2426_v63 }
 0x43f   : > { %v1224_v62 = vpop.f32.mrb[12].mxu0 }
 0x440   : > { %v1477_v1 = vmul.f32 -1.442695, %v1224_v62  ;;  %v1226_v56 = vpop.f32.mrb[13].mxu0 }
 0x441   : > { %v1479_v53 = vmul.f32 -1.442695, %v1226_v56 }
 0x442   : > { %1887 = vpow2.f32 %v1477_v1  ;;  %v1093_v43 = vpop.f32.mrb[12].mxu1 }
 0x443   : > { %1889 = vpow2.f32 %v1479_v53  ;;  %v1475_v51 = vmul.f32 -1.442695, %v1093_v43  ;;  %v1095_v61 = vpop.f32.mrb[13].mxu1  ;;  %v1230_v2 = vpop.f32.mrb[14].mxu0  ;;  %v592_v43 = vadd.f32 %v2379_v45, %v2360_v40 }
 0x444   : > { %v1478_v42 = vmul.f32 -1.442695, %v1230_v2  ;;  %v1232_v50 = vpop.f32.mrb[15].mxu0 }
 0x445   : > { %1891 = vpow2.f32 %v1475_v51  ;;  %v1480_v47 = vmul.f32 -1.442695, %v1232_v50  ;;  %v1116_v51 = vmax.f32 %v1095_v61, 0.0  ;;  %v842_v2 = vadd.f32 %v2399_v46, %v592_v43 }
 0x446   : > { %1893 = vpow2.f32 %v1478_v42  ;;  %v1099_v48 = vpop.f32.mrb[14].mxu1  ;;  %v593_v50 = vadd.f32 %v2385_v52, %v2367_v41 }
 0x447   : > { %1895 = vpow2.f32 %v1480_v47  ;;  %v1476_v4 = vmul.f32 -1.442695, %v1099_v48  ;;  %v1101_v5 = vpop.f32.mrb[15].mxu1 }
 0x449   : > { %1897 = vpow2.f32 %v1476_v4  ;;  %v1118_v4 = vsub.f32 %v1116_v51, %v2399_v46 }
 0x44c   : > { %v1888_v6 = vpop.eup %1887 }
 0x44d   : > { %v1890_v60 = vpop.eup %1889  ;;  %v1241_v54 = vadd.f32 1.0, %v1888_v6  ;;  %v1117_v6 = vmax.f32 %v1101_v5, 0.0 }
 0x44e   : > { %v1253_v58 = vadd.f32 1.0, %v1890_v60 }
 0x44f   : > { %v1892_v55 = vpop.eup %1891  ;;  %v1119_v52 = vsub.f32 %v1117_v6, %v2412_v57 }
 0x450   : > { %v1894_v7 = vpop.eup %1893  ;;  %1899 = vrcp.f32 %v1253_v58  ;;  %v1110_v0 = vadd.f32 1.0, %v1892_v55  ;;  %v864_v58 = vadd.f32 %v2392_v49, %v842_v2 }
 0x451   : > { %v1896_v3 = vpop.eup %1895  ;;  %1901 = vrcp.f32 %v1241_v54  ;;  %v1242_v62 = vadd.f32 1.0, %v1894_v7  ;;  %v843_v54 = vadd.f32 %v2412_v57, %v593_v50 }
 0x452   : > { %1903 = vrcp.f32 %v1110_v0  ;;  %v1254_v1 = vadd.f32 1.0, %v1896_v3  ;;  %v993_v7 = vadd.f32 %v2421_v59, %v864_v58 }
 0x453   : > { %v1898_v56 = vpop.eup %1897  ;;  %v865_v5 = vadd.f32 %v2404_v44, %v843_v54 }
 0x454   : > { %1905 = vrcp.f32 %v1254_v1  ;;  %v1111_v53 = vadd.f32 1.0, %v1898_v56 }
 0x455   : > { %1907 = vrcp.f32 %v1242_v62  ;;  %v994_v2 = vadd.f32 %v2426_v63, %v865_v5 }
 0x456   : > { %1909 = vrcp.f32 %v1111_v53 }
 0x45a   : > { %v1900_v42 = vpop.eup %1899 }
 0x45b   : > { %v1902_v47 = vpop.eup %1901  ;;  %v1259_v48 = vsub.f32 %v1900_v42, %v2392_v49 }
 0x45c   : > { %v1904_v60 = vpop.eup %1903 }
 0x45d   : > { %v1120_v55 = vmul.f32 %v1904_v60, %v1118_v4  ;;  %v1261_v40 = vmul.f32 %v1902_v47, %v1259_v48 }
 0x45e   : > { %v1906_v45 = vpop.eup %1905 }
 0x45f   : > { %v1908_v61 = vpop.eup %1907  ;;  %v1122_v0 = vadd.f32 %v1120_v55, %v2399_v46  ;;  %v1260_v41 = vsub.f32 %v1906_v45, %v2404_v44  ;;  %v1263_v1 = vadd.f32 %v1261_v40, %v2392_v49 }
 0x460   : > { %v1910_v3 = vpop.eup %1909 }
 0x461   : > { %v1124_v62 = vadd.f32 %v1122_v0, %v993_v7  ;;  %v1121_v56 = vmul.f32 %v1910_v3, %v1119_v52  ;;  %v1262_v53 = vmul.f32 %v1908_v61, %v1260_v41 }
 0x462   : > { %v1365_v43 = vpop.f32.mrb[16].mxu1 }
 0x463   : > { %v1265_v51 = vadd.f32 %v1263_v1, %v1124_v62  ;;  %v1123_v42 = vadd.f32 %v1121_v56, %v2412_v57  ;;  %v1481_v50 = vmul.f32 -1.442695, %v1365_v43  ;;  %v1367_v46 = vpop.f32.mrb[17].mxu1  ;;  %v1264_v48 = vadd.f32 %v1262_v53, %v2404_v44 }
 0x465   : > { %v1125_v47 = vadd.f32 %v1123_v42, %v994_v2  ;;  %1911 = vpow2.f32 %v1481_v50 }
 0x466   : > { %v1371_v4 = vpop.f32.mrb[18].mxu1 }
 0x467   : > { %v1266_v6 = vadd.f32 %v1264_v48, %v1125_v47  ;;  %v1482_v60 = vmul.f32 -1.442695, %v1371_v4  ;;  %v1373_v54 = vpop.f32.mrb[19].mxu1 }
 0x469   : > { %1913 = vpow2.f32 %v1482_v60 }
 0x46a   : > { %1915 = vtanh.f32 %v1367_v46 }
 0x46b   : > { %1917 = vtanh.f32 %v1373_v54 }
 0x46f   : > { %v1912_v49 = vpop.eup %1911 }
 0x470   : > { %v1382_v58 = vadd.f32 1.0, %v1912_v49 }
 0x472   : > { %1919 = vrcp.f32 %v1382_v58 }
 0x473   : > { %v1914_v55 = vpop.eup %1913 }
 0x474   : > { %v1383_v40 = vadd.f32 1.0, %v1914_v55  ;;  %v1916_v57 = vpop.eup %1915 }
 0x475   : > { %v1918_v45 = vpop.eup %1917  ;;  %v1390_v61 = vsub.f32 %v1916_v57, %v2421_v59 }
 0x476   : > { %1921 = vrcp.f32 %v1383_v40  ;;  %v1391_v41 = vsub.f32 %v1918_v45, %v2426_v63 }
 0x47c   : > { %v1920_v44 = vpop.eup %1919 }
 0x47d   : > { %v1392_v7 = vmul.f32 %v1920_v44, %v1390_v61 }
 0x47f   : > { %v1394_v0 = vadd.f32 %v1392_v7, %v2421_v59 }
 0x480   : > { %v1922_v52 = vpop.eup %1921 }
 0x481   : > { %v1396_v3 = vadd.f32 %v1394_v0, %v1265_v51  ;;  %v1393_v5 = vmul.f32 %v1922_v52, %v1391_v41 }
 0x483   : > { %v1398_v40 = vmul.f32 0.125, %v1396_v3   ;;  %v1395_v62 = vadd.f32 %v1393_v5, %v2426_v63  ;;  %143 = sbr.rel (!%p141_p12) target bundleno = 107 (0x6b), region = 65 }
 0x485   : > { %1401 = vst [vmem:[%s1400_s30] sm:$0xff] %v1398_v40  ;;  %v1397_v1 = vadd.f32 %v1395_v62, %v1266_v6 }
 0x487   : > { %v1399_v41 = vmul.f32 0.125, %v1397_v1  }
 0x489   : > { %1402 = vst [vmem:[%s1400_s30 + $0x8] sm:$0xff] %v1399_v41 }
 0x48a   :  { %2044 = shalt.err (!%p2041_p3)
}
 0x48b   :  { %s2045_s11 = scalar_lea.hbm %s2480_s5, 2048 }
 0x48c   :  { %p2046_p4 = scmp.ne.s32.totalorder %s2480_s5, %s2045_s11  ;;  %p2049_p5 = scmp.lt.u32.totalorder %s2045_s11, %s2480_s5 }
 0x48e   :  { %p2051_p6 = pnand %p2049_p5, %p2046_p4 }
 0x490   :  { %2054 = shalt.err (!%p2051_p6)
}
 0x491   :  { %1416 = dma.vmem_to_hbm [thread:$0]  %s1411_s7, 2048, %s2480_s5, [#allocation9], %s2092_s28, %s2092_s28, %s2093_s29  }
 0x492   :  { %2077 = dma.done.wait [#allocation9], 2048  }
 0x493   :  { %2078 = vsyncadd [#allocation9], 4294965248 }
 0x494   :  { %1420 = vsyncpa [#allocation8], 1 }
 0x495   :  { %1421 = vsyncpa [#allocation11], 1 }
 0x496   :  { %1422 = vsyncpa [#allocation9], 1 }
 0x497   :  { %1423 = vsyncmov [#allocation6] }
 0x49a   :  { %s1424_s0 = vpop.sfrf %1423 }
 0x49b   :  { %p1483_p7 = scmp.ne.s32.totalorder %s1424_s0, 0 }
 0x49d   :  { %1428 = shalt.err (%p1483_p7)  }
 0x49e   :  { %1430 = vsyncmov [#allocation6 + $0x1] }
 0x4a1   :  { %s1431_s17 = vpop.sfrf %1430 }
 0x4a2   :  { %p1484_p8 = scmp.ne.s32.totalorder %s1431_s17, 0 }
 0x4a4   :  { %1435 = shalt.err (%p1484_p8)  }
 0x4a5   :  { %1437 = vsyncmov [#allocation6 + $0x2] }
 0x4a8   :  { %s1438_s18 = vpop.sfrf %1437 }
 0x4a9   :  { %p1485_p9 = scmp.ne.s32.totalorder %s1438_s18, 0 }
 0x4ab   :  { %1442 = shalt.err (%p1485_p9)  }

</bundles_post_ra>
